<compile_context>
chip_gen: v7x
topology: tpu7x:2x2x1
jax: 0.10.0
libtpu: 0.0.40
codegen_flags: <defaults>
</compile_context>

<pallas_src>
import functools

import jax
import jax.numpy as jnp
from jax import lax
from jax.experimental import pallas as pl
from jax.experimental.pallas import tpu as pltpu
import numpy as np


# ---------------------------------------------------------------------------
# Fused Pallas kernel (all LSTM layers + FC + sigmoid, time-chunked)
# ---------------------------------------------------------------------------

def make_dkt_kernel(num_layers, t_chunk, batch, hidden, n_one_hot, unroll):
    L, H, F, B = num_layers, hidden, n_one_hot, batch
    TB = t_chunk * B

    def kernel(*refs):
        idx_ref = refs[0]                        # (TB, 1) int32, row = t*B + b
        layer_refs = refs[1:1 + 3 * L]           # per layer: w_ih_t, w_hh_t, bias
        fc_w_ref = refs[1 + 3 * L]               # (H, Qp)
        fc_b_ref = refs[2 + 3 * L]               # (1, Qp)
        out_ref = refs[3 + 3 * L]                # (TB, Qp)
        h_state_ref, c_state_ref, h_all_ref, xproj_ref = refs[4 + 3 * L:]

        @pl.when(pl.program_id(0) == 0)
        def _init():
            h_state_ref[...] = jnp.zeros_like(h_state_ref)
            c_state_ref[...] = jnp.zeros_like(c_state_ref)

        # ---- layer-0 input projection for the whole chunk -------------------
        # One-hot built in registers (never touches HBM), one chunk-wide MXU
        # matmul instead of T_chunk tiny (B,F)x(F,4H) matmuls.
        idx_blk = idx_ref[...]                                       # (TB, 1)
        iota_f = lax.broadcasted_iota(jnp.int32, (TB, F), 1)
        one_hot = (idx_blk == iota_f).astype(jnp.float32)            # (TB, F)
        xproj_ref[...] = (
            jnp.dot(one_hot, layer_refs[0][...],
                    preferred_element_type=jnp.float32)
            + layer_refs[2][...])                                    # (TB, 4H)

        for layer in range(L):
            if layer > 0:
                # Hoisted, time-independent input projection for this layer.
                xproj_ref[...] = (
                    jnp.dot(h_all_ref[...], layer_refs[3 * layer][...],
                            preferred_element_type=jnp.float32)
                    + layer_refs[3 * layer + 2][...])

            w_hh = layer_refs[3 * layer + 1][...]                    # (H, 4H)

            def step(t, carry, w_hh=w_hh):
                # h/c stay in vregs across the serial loop (no per-step
                # VMEM round-trip on the critical path).
                h_prev, c_prev = carry
                row = pl.multiple_of(t * B, B)
                gates = (xproj_ref[pl.ds(row, B), :]
                         + jnp.dot(h_prev, w_hh,
                                   preferred_element_type=jnp.float32))
                # Full-vreg EUP passes, then slice. PyTorch gate order i,f,g,o.
                sig = jax.nn.sigmoid(gates)
                th = jnp.tanh(gates)
                i_g = sig[:, 0 * H:1 * H]
                f_g = sig[:, 1 * H:2 * H]
                g_g = th[:, 2 * H:3 * H]
                o_g = sig[:, 3 * H:4 * H]
                c_new = f_g * c_prev + i_g * g_g
                h_new = o_g * jnp.tanh(c_new)
                h_all_ref[pl.ds(row, B), :] = h_new      # single store / step
                return (h_new, c_new)

            carry0 = (h_state_ref[layer], c_state_ref[layer])
            h_last, c_last = lax.fori_loop(0, t_chunk, step, carry0,
                                           unroll=unroll)
            h_state_ref[layer] = h_last                  # written once / chunk
            c_state_ref[layer] = c_last

        # ---- fused final Linear + sigmoid over the whole chunk --------------
        logits = (jnp.dot(h_all_ref[...], fc_w_ref[...],
                          preferred_element_type=jnp.float32)
                  + fc_b_ref[...])
        out_ref[...] = jax.nn.sigmoid(logits)            # (TB, Qp) lane-dense

    return kernel


# ---------------------------------------------------------------------------
# VMEM-aware chunk sizing
# ---------------------------------------------------------------------------

def _vmem_plan(B, H, L, F, Qp):
    """Return (max t_chunk, vmem_limit_bytes) derived from the chip's VMEM."""
    vmem_cap = 64 * 1024 * 1024          # conservative default (v7x per-TC)
    try:
        vmem_cap = int(pltpu.get_tpu_info().vmem_capacity_bytes)
    except Exception:
        pass
    budget = max(vmem_cap // 2, 16 * 1024 * 1024)   # leave compiler headroom
    # Resident weights (double-buffered by the pipeline) + carried h/c state.
    w_elems = (F * 4 * H + 4 * H                     # layer-0 W_ih + bias
               + L * H * 4 * H                       # W_hh (all layers)
               + (L - 1) * (H * 4 * H + 4 * H)       # layer>=1 W_ih + bias
               + H * Qp + Qp)                        # fc weight + bias
    fixed = 2 * 4 * w_elems + 2 * L * B * H * 4
    # Per-timestep bytes: xproj + h_all scratch, double-buffered out + idx.
    per_t = 4 * B * (4 * H + H + 2 * Qp + 2)
    tc_cap = max(8, ((budget - fixed) // per_t) // 8 * 8)
    return tc_cap, budget


# ---------------------------------------------------------------------------
# Wrapper
# ---------------------------------------------------------------------------

@functools.partial(jax.jit, static_argnames=("num_questions", "t_chunk"))
def dkt_forward(q_ids, a_ids, params, num_questions, t_chunk=256):
    """q_ids, a_ids: int32 (B, T). Returns (B, T, num_questions) float32."""
    B, T = q_ids.shape
    L = len(params["lstm"])
    H = params["lstm"][0][1].shape[0]
    F = (num_questions + 1) * 2
    Q = num_questions
    Qp = pl.cdiv(Q, 128) * 128               # lane-dense output width

    # Only the tiny int32 index stream goes through HBM (no one-hot array).
    idx = (a_ids * num_questions + q_ids).astype(jnp.int32)   # (B, T)
    idx_tm = idx.T                                             # (T, B)

    tc_cap, vmem_budget = _vmem_plan(B, H, L, F, Qp)
    t_req = max(8, min(t_chunk, tc_cap))
    if T <= t_req:
        tc, t_pad = T, T
    else:
        tc = (t_req // 8) * 8                # keep blocks 8-sublane aligned
        t_pad = pl.cdiv(T, tc) * tc
    if t_pad != T:
        # Padded steps (idx=0) run real LSTM updates on the carried state, but
        # padding is only at the end and the output is sliced back to T, so
        # the returned values are exact.
        idx_tm = jnp.pad(idx_tm, ((0, t_pad - T), (0, 0)))
    n_chunks = t_pad // tc
    idx2d = idx_tm.reshape(t_pad * B, 1)                       # row = t*B + b

    # Zero-pad FC params so the kernel output last dim is a multiple of 128.
    fc_w_t = params["fc_w_t"]
    fc_b = params["fc_b"]
    if Qp != Q:
        fc_w_t = jnp.pad(fc_w_t, ((0, 0), (0, Qp - Q)))
        fc_b = jnp.pad(fc_b, ((0, 0), (0, Qp - Q)))

    weights = []
    in_specs = [pl.BlockSpec((tc * B, 1), lambda c: (c, 0))]
    for (w_ih_t, w_hh_t, b) in params["lstm"]:
        weights += [w_ih_t, w_hh_t, b]
        in_specs += [pl.BlockSpec(w_ih_t.shape, lambda c: (0, 0)),
                     pl.BlockSpec(w_hh_t.shape, lambda c: (0, 0)),
                     pl.BlockSpec(b.shape, lambda c: (0, 0))]
    weights += [fc_w_t, fc_b]
    in_specs += [pl.BlockSpec(fc_w_t.shape, lambda c: (0, 0)),
                 pl.BlockSpec(fc_b.shape, lambda c: (0, 0))]

    kernel = make_dkt_kernel(L, tc, B, H, F, unroll=min(8, tc))

    out2d = pl.pallas_call(
        kernel,
        out_shape=jax.ShapeDtypeStruct((t_pad * B, Qp), jnp.float32),
        grid=(n_chunks,),
        in_specs=in_specs,
        out_specs=pl.BlockSpec((tc * B, Qp), lambda c: (c, 0)),
        scratch_shapes=[
            pltpu.VMEM((L, B, H), jnp.float32),        # h state (carried)
            pltpu.VMEM((L, B, H), jnp.float32),        # c state (carried)
            pltpu.VMEM((tc * B, H), jnp.float32),      # chunk hidden outputs
            pltpu.VMEM((tc * B, 4 * H), jnp.float32),  # hoisted input projection
        ],
        compiler_params=pltpu.CompilerParams(
            dimension_semantics=("arbitrary",),        # time recurrence serial
            vmem_limit_bytes=vmem_budget),
    )(idx2d, *weights)

    out = out2d.reshape(t_pad, B, Qp)[:T, :, :Q]       # drop time + lane padding
    return jnp.transpose(out, (1, 0, 2))               # (B, T, Q) batch_first


# ---------------------------------------------------------------------------
# Deterministic parameter init (matches nn.LSTM / nn.Linear shapes)
# ---------------------------------------------------------------------------

def init_params(key, num_questions, hidden_size, num_layers):
    n_one_hot = (num_questions + 1) * 2
    k = 1.0 / np.sqrt(hidden_size)
    lstm = []
    for layer in range(num_layers):
        in_dim = n_one_hot if layer == 0 else hidden_size
        key, k1, k2, k3, k4 = jax.random.split(key, 5)
        w_ih = jax.random.uniform(k1, (4 * hidden_size, in_dim), jnp.float32, -k, k)
        w_hh = jax.random.uniform(k2, (4 * hidden_size, hidden_size), jnp.float32, -k, k)
        b_ih = jax.random.uniform(k3, (4 * hidden_size,), jnp.float32, -k, k)
        b_hh = jax.random.uniform(k4, (4 * hidden_size,), jnp.float32, -k, k)
        lstm.append((w_ih.T, w_hh.T, (b_ih + b_hh).reshape(1, -1)))
    key, k5, k6 = jax.random.split(key, 3)
    kf = 1.0 / np.sqrt(hidden_size)
    fc_w = jax.random.uniform(k5, (num_questions, hidden_size), jnp.float32, -kf, kf)
    fc_b = jax.random.uniform(k6, (num_questions,), jnp.float32, -kf, kf)
    return {"lstm": tuple(lstm), "fc_w_t": fc_w.T, "fc_b": fc_b.reshape(1, -1)}


# ---------------------------------------------------------------------------
# Pure-JAX reference (for correctness check only)
# ---------------------------------------------------------------------------

def dkt_reference(q_ids, a_ids, params, num_questions, hidden_size):
    n_one_hot = (num_questions + 1) * 2
    idx = a_ids * num_questions + q_ids
    x = jax.nn.one_hot(idx, n_one_hot, dtype=jnp.float32)   # (B, T, F)
    x = jnp.transpose(x, (1, 0, 2))                         # (T, B, F)
    B = x.shape[1]
    H = hidden_size
    h = x
    for (w_ih_t, w_hh_t, b) in params["lstm"]:
        def step(carry, x_t):
            h_prev, c_prev = carry
            gates = x_t @ w_ih_t + h_prev @ w_hh_t + b
            i = jax.nn.sigmoid(gates[:, 0 * H:1 * H])
            f = jax.nn.sigmoid(gates[:, 1 * H:2 * H])
            g = jnp.tanh(gates[:, 2 * H:3 * H])
            o = jax.nn.sigmoid(gates[:, 3 * H:4 * H])
            c = f * c_prev + i * g
            hh = o * jnp.tanh(c)
            return (hh, c), hh
        init = (jnp.zeros((B, H), jnp.float32), jnp.zeros((B, H), jnp.float32))
        _, h = lax.scan(step, init, h)
    out = jax.nn.sigmoid(h @ params["fc_w_t"] + params["fc_b"])  # (T, B, Q)
    return jnp.transpose(out, (1, 0, 2))


# ---------------------------------------------------------------------------

if __name__ == "__main__":
    num_questions = 8
    hidden_size = 32
    num_layers = 2
    batch = 8        # fills all 8 sublanes of each vreg
    seq_len = 12     # not a multiple of the time chunk -> exercises padding

    key = jax.random.PRNGKey(0)
    key, kq, ka, kp = jax.random.split(key, 4)
    q = jax.random.randint(kq, (batch, seq_len), 0, num_questions, dtype=jnp.int32)
    a = jax.random.randint(ka, (batch, seq_len), 0, 2, dtype=jnp.int32)
    params = init_params(kp, num_questions, hidden_size, num_layers)

    # t_chunk=8 -> 2 time chunks, state carried across grid steps.
    out = dkt_forward(q, a, params, num_questions, t_chunk=8)
    out = jax.block_until_ready(out)

    ref = dkt_reference(q, a, params, num_questions, hidden_size)
    np.testing.assert_allclose(np.asarray(out), np.asarray(ref), rtol=1e-5, atol=1e-5)

    assert out.shape == (batch, seq_len, num_questions)
    print("KERNEL_OK")
</pallas_src>

<mosaic_0001>
module attributes {stable_mosaic.version = 11 : i64} {
  func.func @kernel(%arg0: i32, %arg1: memref<64x1xi32, #tpu.memory_space<vmem>>, %arg2: memref<18x128xf32, #tpu.memory_space<vmem>>, %arg3: memref<32x128xf32, #tpu.memory_space<vmem>>, %arg4: memref<1x128xf32, #tpu.memory_space<vmem>>, %arg5: memref<32x128xf32, #tpu.memory_space<vmem>>, %arg6: memref<32x128xf32, #tpu.memory_space<vmem>>, %arg7: memref<1x128xf32, #tpu.memory_space<vmem>>, %arg8: memref<32x128xf32, #tpu.memory_space<vmem>>, %arg9: memref<1x128xf32, #tpu.memory_space<vmem>>, %arg10: memref<64x128xf32, #tpu.memory_space<vmem>>, %arg11: memref<2x8x32xf32, #tpu.memory_space<vmem>>, %arg12: memref<2x8x32xf32, #tpu.memory_space<vmem>>, %arg13: memref<64x32xf32, #tpu.memory_space<vmem>>, %arg14: memref<64x128xf32, #tpu.memory_space<vmem>>) attributes {dimension_semantics = [#tpu.dimension_semantics<arbitrary>], iteration_bounds = array<i64: 2>, scalar_prefetch = 0 : i64, scratch_operands = 4 : i64, tpu.core_type = #tpu.core_type<tc>, window_params = [{transform_indices = @transform_0, window_bounds = array<i64: 64, 1>}, {pipeline_mode = #tpu.pipeline_mode<synchronous>, transform_indices = @transform_1, window_bounds = array<i64: 18, 128>}, {pipeline_mode = #tpu.pipeline_mode<synchronous>, transform_indices = @transform_2, window_bounds = array<i64: 32, 128>}, {pipeline_mode = #tpu.pipeline_mode<synchronous>, transform_indices = @transform_3, window_bounds = array<i64: 1, 128>}, {pipeline_mode = #tpu.pipeline_mode<synchronous>, transform_indices = @transform_4, window_bounds = array<i64: 32, 128>}, {pipeline_mode = #tpu.pipeline_mode<synchronous>, transform_indices = @transform_5, window_bounds = array<i64: 32, 128>}, {pipeline_mode = #tpu.pipeline_mode<synchronous>, transform_indices = @transform_6, window_bounds = array<i64: 1, 128>}, {pipeline_mode = #tpu.pipeline_mode<synchronous>, transform_indices = @transform_7, window_bounds = array<i64: 32, 128>}, {pipeline_mode = #tpu.pipeline_mode<synchronous>, transform_indices = @transform_8, window_bounds = array<i64: 1, 128>}, {transform_indices = @transform_9, window_bounds = array<i64: 64, 128>}]} {
    %c0_i32 = arith.constant 0 : i32
    %0 = arith.cmpi eq, %arg0, %c0_i32 : i32
    %1 = arith.extui %0 : i1 to i32
    %c0_i32_0 = arith.constant 0 : i32
    %2 = arith.cmpi ne, %1, %c0_i32_0 : i32
    scf.if %2 {
      %cst_144 = arith.constant 0.000000e+00 : f32
      %424 = vector.broadcast %cst_144 : f32 to vector<2x8x32xf32>
      %c0_145 = arith.constant 0 : index
      %c0_146 = arith.constant 0 : index
      %c0_147 = arith.constant 0 : index
      %425 = vector.load %arg11[%c0_145, %c0_146, %c0_147] : memref<2x8x32xf32, #tpu.memory_space<vmem>>, vector<2x8x32xf32>
      tpu.vector_store %arg11[%c0_145, %c0_146, %c0_147], %424 {strides = array<i32>} : memref<2x8x32xf32, #tpu.memory_space<vmem>>, vector<2x8x32xf32>,
      %cst_148 = arith.constant 0.000000e+00 : f32
      %426 = vector.broadcast %cst_148 : f32 to vector<2x8x32xf32>
      %c0_149 = arith.constant 0 : index
      %c0_150 = arith.constant 0 : index
      %c0_151 = arith.constant 0 : index
      %427 = vector.load %arg12[%c0_149, %c0_150, %c0_151] : memref<2x8x32xf32, #tpu.memory_space<vmem>>, vector<2x8x32xf32>
      tpu.vector_store %arg12[%c0_149, %c0_150, %c0_151], %426 {strides = array<i32>} : memref<2x8x32xf32, #tpu.memory_space<vmem>>, vector<2x8x32xf32>,
    } else {
    }
    %c0 = arith.constant 0 : index
    %c0_1 = arith.constant 0 : index
    %3 = vector.load %arg1[%c0, %c0_1] : memref<64x1xi32, #tpu.memory_space<vmem>>, vector<64x1xi32>
    %4 = tpu.iota {dimensions = array<i32: 1>} : vector<64x18xi32>
    %5 = vector.broadcast %3 : vector<64x1xi32> to vector<64x18xi32>
    %6 = arith.cmpi eq, %5, %4 : vector<64x18xi32>
    %7 = arith.extui %6 : vector<64x18xi1> to vector<64x18xi32>
    %8 = arith.sitofp %7 : vector<64x18xi32> to vector<64x18xf32>
    %c0_2 = arith.constant 0 : index
    %c0_3 = arith.constant 0 : index
    %9 = vector.load %arg2[%c0_2, %c0_3] : memref<18x128xf32, #tpu.memory_space<vmem>>, vector<18x128xf32>
    %cst = arith.constant dense<0.000000e+00> : vector<64x128xf32>
    %10 = tpu.matmul %8, %9, %cst {dimension_numbers = #tpu.dot_dimension_numbers<[1], [0], [0], [1], [0, 0, 1, 1], [], []>} : vector<64x18xf32>, vector<18x128xf32>, vector<64x128xf32> -> vector<64x128xf32>
    %c0_4 = arith.constant 0 : index
    %c0_5 = arith.constant 0 : index
    %11 = vector.load %arg4[%c0_4, %c0_5] : memref<1x128xf32, #tpu.memory_space<vmem>>, vector<1x128xf32>
    %12 = vector.broadcast %11 : vector<1x128xf32> to vector<64x128xf32>
    %13 = arith.addf %10, %12 : vector<64x128xf32>
    %c0_6 = arith.constant 0 : index
    %c0_7 = arith.constant 0 : index
    %14 = vector.load %arg14[%c0_6, %c0_7] : memref<64x128xf32, #tpu.memory_space<vmem>>, vector<64x128xf32>
    tpu.vector_store %arg14[%c0_6, %c0_7], %13 {strides = array<i32>} : memref<64x128xf32, #tpu.memory_space<vmem>>, vector<64x128xf32>,
    %c0_8 = arith.constant 0 : index
    %c0_9 = arith.constant 0 : index
    %15 = vector.load %arg3[%c0_8, %c0_9] : memref<32x128xf32, #tpu.memory_space<vmem>>, vector<32x128xf32>
    %c0_10 = arith.constant 0 : index
    %c0_11 = arith.constant 0 : index
    %c0_12 = arith.constant 0 : index
    %16 = vector.load %arg11[%c0_10, %c0_11, %c0_12] : memref<2x8x32xf32, #tpu.memory_space<vmem>>, vector<1x8x32xf32>
    %17 = vector.shape_cast %16 : vector<1x8x32xf32> to vector<8x32xf32>
    %c0_13 = arith.constant 0 : index
    %c0_14 = arith.constant 0 : index
    %c0_15 = arith.constant 0 : index
    %18 = vector.load %arg12[%c0_13, %c0_14, %c0_15] : memref<2x8x32xf32, #tpu.memory_space<vmem>>, vector<1x8x32xf32>
    %19 = vector.shape_cast %18 : vector<1x8x32xf32> to vector<8x32xf32>
    %c0_i32_16 = arith.constant 0 : i32
    %c8_i32 = arith.constant 8 : i32
    %20 = arith.muli %c0_i32_16, %c8_i32 : i32
    %21 = tpu.assume_multiple %20, 8 : i32
    %22 = arith.index_cast %21 : i32 to index
    %c0_17 = arith.constant 0 : index
    %23 = vector.load %arg14[%22, %c0_17] : memref<64x128xf32, #tpu.memory_space<vmem>>, vector<8x128xf32>
    %cst_18 = arith.constant dense<0.000000e+00> : vector<8x128xf32>
    %24 = tpu.matmul %17, %15, %cst_18 {dimension_numbers = #tpu.dot_dimension_numbers<[1], [0], [0], [1], [0, 0, 1, 1], [], []>} : vector<8x32xf32>, vector<32x128xf32>, vector<8x128xf32> -> vector<8x128xf32>
    %25 = arith.addf %23, %24 : vector<8x128xf32>
    %26 = arith.negf %25 : vector<8x128xf32>
    %27 = math.exp %26 : vector<8x128xf32>
    %cst_19 = arith.constant 1.000000e+00 : f32
    %28 = vector.broadcast %cst_19 : f32 to vector<8x128xf32>
    %29 = arith.addf %28, %27 : vector<8x128xf32>
    %30 = arith.divf %28, %29 : vector<8x128xf32>
    %31 = math.tanh %25 : vector<8x128xf32>
    %32 = vector.extract_strided_slice %30 {offsets = [0, 0], sizes = [8, 32], strides = [1, 1]} : vector<8x128xf32> to vector<8x32xf32>
    %33 = vector.extract_strided_slice %30 {offsets = [0, 32], sizes = [8, 32], strides = [1, 1]} : vector<8x128xf32> to vector<8x32xf32>
    %34 = vector.extract_strided_slice %31 {offsets = [0, 64], sizes = [8, 32], strides = [1, 1]} : vector<8x128xf32> to vector<8x32xf32>
    %35 = vector.extract_strided_slice %30 {offsets = [0, 96], sizes = [8, 32], strides = [1, 1]} : vector<8x128xf32> to vector<8x32xf32>
    %36 = arith.mulf %33, %19 : vector<8x32xf32>
    %37 = arith.mulf %32, %34 : vector<8x32xf32>
    %38 = arith.addf %36, %37 : vector<8x32xf32>
    %39 = math.tanh %38 : vector<8x32xf32>
    %40 = arith.mulf %35, %39 : vector<8x32xf32>
    %41 = arith.index_cast %21 : i32 to index
    %c0_20 = arith.constant 0 : index
    %42 = vector.load %arg13[%41, %c0_20] : memref<64x32xf32, #tpu.memory_space<vmem>>, vector<8x32xf32>
    tpu.vector_store %arg13[%41, %c0_20], %40 {strides = array<i32>} : memref<64x32xf32, #tpu.memory_space<vmem>>, vector<8x32xf32>,
    %c1_i32 = arith.constant 1 : i32
    %c8_i32_21 = arith.constant 8 : i32
    %43 = arith.muli %c1_i32, %c8_i32_21 : i32
    %44 = tpu.assume_multiple %43, 8 : i32
    %45 = arith.index_cast %44 : i32 to index
    %c0_22 = arith.constant 0 : index
    %46 = vector.load %arg14[%45, %c0_22] : memref<64x128xf32, #tpu.memory_space<vmem>>, vector<8x128xf32>
    %cst_23 = arith.constant dense<0.000000e+00> : vector<8x128xf32>
    %47 = tpu.matmul %40, %15, %cst_23 {dimension_numbers = #tpu.dot_dimension_numbers<[1], [0], [0], [1], [0, 0, 1, 1], [], []>} : vector<8x32xf32>, vector<32x128xf32>, vector<8x128xf32> -> vector<8x128xf32>
    %48 = arith.addf %46, %47 : vector<8x128xf32>
    %49 = arith.negf %48 : vector<8x128xf32>
    %50 = math.exp %49 : vector<8x128xf32>
    %cst_24 = arith.constant 1.000000e+00 : f32
    %51 = vector.broadcast %cst_24 : f32 to vector<8x128xf32>
    %52 = arith.addf %51, %50 : vector<8x128xf32>
    %53 = arith.divf %51, %52 : vector<8x128xf32>
    %54 = math.tanh %48 : vector<8x128xf32>
    %55 = vector.extract_strided_slice %53 {offsets = [0, 0], sizes = [8, 32], strides = [1, 1]} : vector<8x128xf32> to vector<8x32xf32>
    %56 = vector.extract_strided_slice %53 {offsets = [0, 32], sizes = [8, 32], strides = [1, 1]} : vector<8x128xf32> to vector<8x32xf32>
    %57 = vector.extract_strided_slice %54 {offsets = [0, 64], sizes = [8, 32], strides = [1, 1]} : vector<8x128xf32> to vector<8x32xf32>
    %58 = vector.extract_strided_slice %53 {offsets = [0, 96], sizes = [8, 32], strides = [1, 1]} : vector<8x128xf32> to vector<8x32xf32>
    %59 = arith.mulf %56, %38 : vector<8x32xf32>
    %60 = arith.mulf %55, %57 : vector<8x32xf32>
    %61 = arith.addf %59, %60 : vector<8x32xf32>
    %62 = math.tanh %61 : vector<8x32xf32>
    %63 = arith.mulf %58, %62 : vector<8x32xf32>
    %64 = arith.index_cast %44 : i32 to index
    %c0_25 = arith.constant 0 : index
    %65 = vector.load %arg13[%64, %c0_25] : memref<64x32xf32, #tpu.memory_space<vmem>>, vector<8x32xf32>
    tpu.vector_store %arg13[%64, %c0_25], %63 {strides = array<i32>} : memref<64x32xf32, #tpu.memory_space<vmem>>, vector<8x32xf32>,
    %c2_i32 = arith.constant 2 : i32
    %c8_i32_26 = arith.constant 8 : i32
    %66 = arith.muli %c2_i32, %c8_i32_26 : i32
    %67 = tpu.assume_multiple %66, 8 : i32
    %68 = arith.index_cast %67 : i32 to index
    %c0_27 = arith.constant 0 : index
    %69 = vector.load %arg14[%68, %c0_27] : memref<64x128xf32, #tpu.memory_space<vmem>>, vector<8x128xf32>
    %cst_28 = arith.constant dense<0.000000e+00> : vector<8x128xf32>
    %70 = tpu.matmul %63, %15, %cst_28 {dimension_numbers = #tpu.dot_dimension_numbers<[1], [0], [0], [1], [0, 0, 1, 1], [], []>} : vector<8x32xf32>, vector<32x128xf32>, vector<8x128xf32> -> vector<8x128xf32>
    %71 = arith.addf %69, %70 : vector<8x128xf32>
    %72 = arith.negf %71 : vector<8x128xf32>
    %73 = math.exp %72 : vector<8x128xf32>
    %cst_29 = arith.constant 1.000000e+00 : f32
    %74 = vector.broadcast %cst_29 : f32 to vector<8x128xf32>
    %75 = arith.addf %74, %73 : vector<8x128xf32>
    %76 = arith.divf %74, %75 : vector<8x128xf32>
    %77 = math.tanh %71 : vector<8x128xf32>
    %78 = vector.extract_strided_slice %76 {offsets = [0, 0], sizes = [8, 32], strides = [1, 1]} : vector<8x128xf32> to vector<8x32xf32>
    %79 = vector.extract_strided_slice %76 {offsets = [0, 32], sizes = [8, 32], strides = [1, 1]} : vector<8x128xf32> to vector<8x32xf32>
    %80 = vector.extract_strided_slice %77 {offsets = [0, 64], sizes = [8, 32], strides = [1, 1]} : vector<8x128xf32> to vector<8x32xf32>
    %81 = vector.extract_strided_slice %76 {offsets = [0, 96], sizes = [8, 32], strides = [1, 1]} : vector<8x128xf32> to vector<8x32xf32>
    %82 = arith.mulf %79, %61 : vector<8x32xf32>
    %83 = arith.mulf %78, %80 : vector<8x32xf32>
    %84 = arith.addf %82, %83 : vector<8x32xf32>
    %85 = math.tanh %84 : vector<8x32xf32>
    %86 = arith.mulf %81, %85 : vector<8x32xf32>
    %87 = arith.index_cast %67 : i32 to index
    %c0_30 = arith.constant 0 : index
    %88 = vector.load %arg13[%87, %c0_30] : memref<64x32xf32, #tpu.memory_space<vmem>>, vector<8x32xf32>
    tpu.vector_store %arg13[%87, %c0_30], %86 {strides = array<i32>} : memref<64x32xf32, #tpu.memory_space<vmem>>, vector<8x32xf32>,
    %c3_i32 = arith.constant 3 : i32
    %c8_i32_31 = arith.constant 8 : i32
    %89 = arith.muli %c3_i32, %c8_i32_31 : i32
    %90 = tpu.assume_multiple %89, 8 : i32
    %91 = arith.index_cast %90 : i32 to index
    %c0_32 = arith.constant 0 : index
    %92 = vector.load %arg14[%91, %c0_32] : memref<64x128xf32, #tpu.memory_space<vmem>>, vector<8x128xf32>
    %cst_33 = arith.constant dense<0.000000e+00> : vector<8x128xf32>
    %93 = tpu.matmul %86, %15, %cst_33 {dimension_numbers = #tpu.dot_dimension_numbers<[1], [0], [0], [1], [0, 0, 1, 1], [], []>} : vector<8x32xf32>, vector<32x128xf32>, vector<8x128xf32> -> vector<8x128xf32>
    %94 = arith.addf %92, %93 : vector<8x128xf32>
    %95 = arith.negf %94 : vector<8x128xf32>
    %96 = math.exp %95 : vector<8x128xf32>
    %cst_34 = arith.constant 1.000000e+00 : f32
    %97 = vector.broadcast %cst_34 : f32 to vector<8x128xf32>
    %98 = arith.addf %97, %96 : vector<8x128xf32>
    %99 = arith.divf %97, %98 : vector<8x128xf32>
    %100 = math.tanh %94 : vector<8x128xf32>
    %101 = vector.extract_strided_slice %99 {offsets = [0, 0], sizes = [8, 32], strides = [1, 1]} : vector<8x128xf32> to vector<8x32xf32>
    %102 = vector.extract_strided_slice %99 {offsets = [0, 32], sizes = [8, 32], strides = [1, 1]} : vector<8x128xf32> to vector<8x32xf32>
    %103 = vector.extract_strided_slice %100 {offsets = [0, 64], sizes = [8, 32], strides = [1, 1]} : vector<8x128xf32> to vector<8x32xf32>
    %104 = vector.extract_strided_slice %99 {offsets = [0, 96], sizes = [8, 32], strides = [1, 1]} : vector<8x128xf32> to vector<8x32xf32>
    %105 = arith.mulf %102, %84 : vector<8x32xf32>
    %106 = arith.mulf %101, %103 : vector<8x32xf32>
    %107 = arith.addf %105, %106 : vector<8x32xf32>
    %108 = math.tanh %107 : vector<8x32xf32>
    %109 = arith.mulf %104, %108 : vector<8x32xf32>
    %110 = arith.index_cast %90 : i32 to index
    %c0_35 = arith.constant 0 : index
    %111 = vector.load %arg13[%110, %c0_35] : memref<64x32xf32, #tpu.memory_space<vmem>>, vector<8x32xf32>
    tpu.vector_store %arg13[%110, %c0_35], %109 {strides = array<i32>} : memref<64x32xf32, #tpu.memory_space<vmem>>, vector<8x32xf32>,
    %c4_i32 = arith.constant 4 : i32
    %c8_i32_36 = arith.constant 8 : i32
    %112 = arith.muli %c4_i32, %c8_i32_36 : i32
    %113 = tpu.assume_multiple %112, 8 : i32
    %114 = arith.index_cast %113 : i32 to index
    %c0_37 = arith.constant 0 : index
    %115 = vector.load %arg14[%114, %c0_37] : memref<64x128xf32, #tpu.memory_space<vmem>>, vector<8x128xf32>
    %cst_38 = arith.constant dense<0.000000e+00> : vector<8x128xf32>
    %116 = tpu.matmul %109, %15, %cst_38 {dimension_numbers = #tpu.dot_dimension_numbers<[1], [0], [0], [1], [0, 0, 1, 1], [], []>} : vector<8x32xf32>, vector<32x128xf32>, vector<8x128xf32> -> vector<8x128xf32>
    %117 = arith.addf %115, %116 : vector<8x128xf32>
    %118 = arith.negf %117 : vector<8x128xf32>
    %119 = math.exp %118 : vector<8x128xf32>
    %cst_39 = arith.constant 1.000000e+00 : f32
    %120 = vector.broadcast %cst_39 : f32 to vector<8x128xf32>
    %121 = arith.addf %120, %119 : vector<8x128xf32>
    %122 = arith.divf %120, %121 : vector<8x128xf32>
    %123 = math.tanh %117 : vector<8x128xf32>
    %124 = vector.extract_strided_slice %122 {offsets = [0, 0], sizes = [8, 32], strides = [1, 1]} : vector<8x128xf32> to vector<8x32xf32>
    %125 = vector.extract_strided_slice %122 {offsets = [0, 32], sizes = [8, 32], strides = [1, 1]} : vector<8x128xf32> to vector<8x32xf32>
    %126 = vector.extract_strided_slice %123 {offsets = [0, 64], sizes = [8, 32], strides = [1, 1]} : vector<8x128xf32> to vector<8x32xf32>
    %127 = vector.extract_strided_slice %122 {offsets = [0, 96], sizes = [8, 32], strides = [1, 1]} : vector<8x128xf32> to vector<8x32xf32>
    %128 = arith.mulf %125, %107 : vector<8x32xf32>
    %129 = arith.mulf %124, %126 : vector<8x32xf32>
    %130 = arith.addf %128, %129 : vector<8x32xf32>
    %131 = math.tanh %130 : vector<8x32xf32>
    %132 = arith.mulf %127, %131 : vector<8x32xf32>
    %133 = arith.index_cast %113 : i32 to index
    %c0_40 = arith.constant 0 : index
    %134 = vector.load %arg13[%133, %c0_40] : memref<64x32xf32, #tpu.memory_space<vmem>>, vector<8x32xf32>
    tpu.vector_store %arg13[%133, %c0_40], %132 {strides = array<i32>} : memref<64x32xf32, #tpu.memory_space<vmem>>, vector<8x32xf32>,
    %c5_i32 = arith.constant 5 : i32
    %c8_i32_41 = arith.constant 8 : i32
    %135 = arith.muli %c5_i32, %c8_i32_41 : i32
    %136 = tpu.assume_multiple %135, 8 : i32
    %137 = arith.index_cast %136 : i32 to index
    %c0_42 = arith.constant 0 : index
    %138 = vector.load %arg14[%137, %c0_42] : memref<64x128xf32, #tpu.memory_space<vmem>>, vector<8x128xf32>
    %cst_43 = arith.constant dense<0.000000e+00> : vector<8x128xf32>
    %139 = tpu.matmul %132, %15, %cst_43 {dimension_numbers = #tpu.dot_dimension_numbers<[1], [0], [0], [1], [0, 0, 1, 1], [], []>} : vector<8x32xf32>, vector<32x128xf32>, vector<8x128xf32> -> vector<8x128xf32>
    %140 = arith.addf %138, %139 : vector<8x128xf32>
    %141 = arith.negf %140 : vector<8x128xf32>
    %142 = math.exp %141 : vector<8x128xf32>
    %cst_44 = arith.constant 1.000000e+00 : f32
    %143 = vector.broadcast %cst_44 : f32 to vector<8x128xf32>
    %144 = arith.addf %143, %142 : vector<8x128xf32>
    %145 = arith.divf %143, %144 : vector<8x128xf32>
    %146 = math.tanh %140 : vector<8x128xf32>
    %147 = vector.extract_strided_slice %145 {offsets = [0, 0], sizes = [8, 32], strides = [1, 1]} : vector<8x128xf32> to vector<8x32xf32>
    %148 = vector.extract_strided_slice %145 {offsets = [0, 32], sizes = [8, 32], strides = [1, 1]} : vector<8x128xf32> to vector<8x32xf32>
    %149 = vector.extract_strided_slice %146 {offsets = [0, 64], sizes = [8, 32], strides = [1, 1]} : vector<8x128xf32> to vector<8x32xf32>
    %150 = vector.extract_strided_slice %145 {offsets = [0, 96], sizes = [8, 32], strides = [1, 1]} : vector<8x128xf32> to vector<8x32xf32>
    %151 = arith.mulf %148, %130 : vector<8x32xf32>
    %152 = arith.mulf %147, %149 : vector<8x32xf32>
    %153 = arith.addf %151, %152 : vector<8x32xf32>
    %154 = math.tanh %153 : vector<8x32xf32>
    %155 = arith.mulf %150, %154 : vector<8x32xf32>
    %156 = arith.index_cast %136 : i32 to index
    %c0_45 = arith.constant 0 : index
    %157 = vector.load %arg13[%156, %c0_45] : memref<64x32xf32, #tpu.memory_space<vmem>>, vector<8x32xf32>
    tpu.vector_store %arg13[%156, %c0_45], %155 {strides = array<i32>} : memref<64x32xf32, #tpu.memory_space<vmem>>, vector<8x32xf32>,
    %c6_i32 = arith.constant 6 : i32
    %c8_i32_46 = arith.constant 8 : i32
    %158 = arith.muli %c6_i32, %c8_i32_46 : i32
    %159 = tpu.assume_multiple %158, 8 : i32
    %160 = arith.index_cast %159 : i32 to index
    %c0_47 = arith.constant 0 : index
    %161 = vector.load %arg14[%160, %c0_47] : memref<64x128xf32, #tpu.memory_space<vmem>>, vector<8x128xf32>
    %cst_48 = arith.constant dense<0.000000e+00> : vector<8x128xf32>
    %162 = tpu.matmul %155, %15, %cst_48 {dimension_numbers = #tpu.dot_dimension_numbers<[1], [0], [0], [1], [0, 0, 1, 1], [], []>} : vector<8x32xf32>, vector<32x128xf32>, vector<8x128xf32> -> vector<8x128xf32>
    %163 = arith.addf %161, %162 : vector<8x128xf32>
    %164 = arith.negf %163 : vector<8x128xf32>
    %165 = math.exp %164 : vector<8x128xf32>
    %cst_49 = arith.constant 1.000000e+00 : f32
    %166 = vector.broadcast %cst_49 : f32 to vector<8x128xf32>
    %167 = arith.addf %166, %165 : vector<8x128xf32>
    %168 = arith.divf %166, %167 : vector<8x128xf32>
    %169 = math.tanh %163 : vector<8x128xf32>
    %170 = vector.extract_strided_slice %168 {offsets = [0, 0], sizes = [8, 32], strides = [1, 1]} : vector<8x128xf32> to vector<8x32xf32>
    %171 = vector.extract_strided_slice %168 {offsets = [0, 32], sizes = [8, 32], strides = [1, 1]} : vector<8x128xf32> to vector<8x32xf32>
    %172 = vector.extract_strided_slice %169 {offsets = [0, 64], sizes = [8, 32], strides = [1, 1]} : vector<8x128xf32> to vector<8x32xf32>
    %173 = vector.extract_strided_slice %168 {offsets = [0, 96], sizes = [8, 32], strides = [1, 1]} : vector<8x128xf32> to vector<8x32xf32>
    %174 = arith.mulf %171, %153 : vector<8x32xf32>
    %175 = arith.mulf %170, %172 : vector<8x32xf32>
    %176 = arith.addf %174, %175 : vector<8x32xf32>
    %177 = math.tanh %176 : vector<8x32xf32>
    %178 = arith.mulf %173, %177 : vector<8x32xf32>
    %179 = arith.index_cast %159 : i32 to index
    %c0_50 = arith.constant 0 : index
    %180 = vector.load %arg13[%179, %c0_50] : memref<64x32xf32, #tpu.memory_space<vmem>>, vector<8x32xf32>
    tpu.vector_store %arg13[%179, %c0_50], %178 {strides = array<i32>} : memref<64x32xf32, #tpu.memory_space<vmem>>, vector<8x32xf32>,
    %c7_i32 = arith.constant 7 : i32
    %c8_i32_51 = arith.constant 8 : i32
    %181 = arith.muli %c7_i32, %c8_i32_51 : i32
    %182 = tpu.assume_multiple %181, 8 : i32
    %183 = arith.index_cast %182 : i32 to index
    %c0_52 = arith.constant 0 : index
    %184 = vector.load %arg14[%183, %c0_52] : memref<64x128xf32, #tpu.memory_space<vmem>>, vector<8x128xf32>
    %cst_53 = arith.constant dense<0.000000e+00> : vector<8x128xf32>
    %185 = tpu.matmul %178, %15, %cst_53 {dimension_numbers = #tpu.dot_dimension_numbers<[1], [0], [0], [1], [0, 0, 1, 1], [], []>} : vector<8x32xf32>, vector<32x128xf32>, vector<8x128xf32> -> vector<8x128xf32>
    %186 = arith.addf %184, %185 : vector<8x128xf32>
    %187 = arith.negf %186 : vector<8x128xf32>
    %188 = math.exp %187 : vector<8x128xf32>
    %cst_54 = arith.constant 1.000000e+00 : f32
    %189 = vector.broadcast %cst_54 : f32 to vector<8x128xf32>
    %190 = arith.addf %189, %188 : vector<8x128xf32>
    %191 = arith.divf %189, %190 : vector<8x128xf32>
    %192 = math.tanh %186 : vector<8x128xf32>
    %193 = vector.extract_strided_slice %191 {offsets = [0, 0], sizes = [8, 32], strides = [1, 1]} : vector<8x128xf32> to vector<8x32xf32>
    %194 = vector.extract_strided_slice %191 {offsets = [0, 32], sizes = [8, 32], strides = [1, 1]} : vector<8x128xf32> to vector<8x32xf32>
    %195 = vector.extract_strided_slice %192 {offsets = [0, 64], sizes = [8, 32], strides = [1, 1]} : vector<8x128xf32> to vector<8x32xf32>
    %196 = vector.extract_strided_slice %191 {offsets = [0, 96], sizes = [8, 32], strides = [1, 1]} : vector<8x128xf32> to vector<8x32xf32>
    %197 = arith.mulf %194, %176 : vector<8x32xf32>
    %198 = arith.mulf %193, %195 : vector<8x32xf32>
    %199 = arith.addf %197, %198 : vector<8x32xf32>
    %200 = math.tanh %199 : vector<8x32xf32>
    %201 = arith.mulf %196, %200 : vector<8x32xf32>
    %202 = arith.index_cast %182 : i32 to index
    %c0_55 = arith.constant 0 : index
    %203 = vector.load %arg13[%202, %c0_55] : memref<64x32xf32, #tpu.memory_space<vmem>>, vector<8x32xf32>
    tpu.vector_store %arg13[%202, %c0_55], %201 {strides = array<i32>} : memref<64x32xf32, #tpu.memory_space<vmem>>, vector<8x32xf32>,
    %c8_i32_56 = arith.constant 8 : i32
    %c0_57 = arith.constant 0 : index
    %c0_58 = arith.constant 0 : index
    %c0_59 = arith.constant 0 : index
    %204 = vector.load %arg11[%c0_57, %c0_58, %c0_59] : memref<2x8x32xf32, #tpu.memory_space<vmem>>, vector<1x8x32xf32>
    %205 = vector.shape_cast %204 : vector<1x8x32xf32> to vector<8x32xf32>
    %206 = vector.shape_cast %201 : vector<8x32xf32> to vector<1x8x32xf32>
    tpu.vector_store %arg11[%c0_57, %c0_58, %c0_59], %206 {strides = array<i32>} : memref<2x8x32xf32, #tpu.memory_space<vmem>>, vector<1x8x32xf32>,
    %c0_60 = arith.constant 0 : index
    %c0_61 = arith.constant 0 : index
    %c0_62 = arith.constant 0 : index
    %207 = vector.load %arg12[%c0_60, %c0_61, %c0_62] : memref<2x8x32xf32, #tpu.memory_space<vmem>>, vector<1x8x32xf32>
    %208 = vector.shape_cast %207 : vector<1x8x32xf32> to vector<8x32xf32>
    %209 = vector.shape_cast %199 : vector<8x32xf32> to vector<1x8x32xf32>
    tpu.vector_store %arg12[%c0_60, %c0_61, %c0_62], %209 {strides = array<i32>} : memref<2x8x32xf32, #tpu.memory_space<vmem>>, vector<1x8x32xf32>,
    %c0_63 = arith.constant 0 : index
    %c0_64 = arith.constant 0 : index
    %210 = vector.load %arg13[%c0_63, %c0_64] : memref<64x32xf32, #tpu.memory_space<vmem>>, vector<64x32xf32>
    %c0_65 = arith.constant 0 : index
    %c0_66 = arith.constant 0 : index
    %211 = vector.load %arg5[%c0_65, %c0_66] : memref<32x128xf32, #tpu.memory_space<vmem>>, vector<32x128xf32>
    %cst_67 = arith.constant dense<0.000000e+00> : vector<64x128xf32>
    %212 = tpu.matmul %210, %211, %cst_67 {dimension_numbers = #tpu.dot_dimension_numbers<[1], [0], [0], [1], [0, 0, 1, 1], [], []>} : vector<64x32xf32>, vector<32x128xf32>, vector<64x128xf32> -> vector<64x128xf32>
    %c0_68 = arith.constant 0 : index
    %c0_69 = arith.constant 0 : index
    %213 = vector.load %arg7[%c0_68, %c0_69] : memref<1x128xf32, #tpu.memory_space<vmem>>, vector<1x128xf32>
    %214 = vector.broadcast %213 : vector<1x128xf32> to vector<64x128xf32>
    %215 = arith.addf %212, %214 : vector<64x128xf32>
    %c0_70 = arith.constant 0 : index
    %c0_71 = arith.constant 0 : index
    %216 = vector.load %arg14[%c0_70, %c0_71] : memref<64x128xf32, #tpu.memory_space<vmem>>, vector<64x128xf32>
    tpu.vector_store %arg14[%c0_70, %c0_71], %215 {strides = array<i32>} : memref<64x128xf32, #tpu.memory_space<vmem>>, vector<64x128xf32>,
    %c0_72 = arith.constant 0 : index
    %c0_73 = arith.constant 0 : index
    %217 = vector.load %arg6[%c0_72, %c0_73] : memref<32x128xf32, #tpu.memory_space<vmem>>, vector<32x128xf32>
    %c1 = arith.constant 1 : index
    %c0_74 = arith.constant 0 : index
    %c0_75 = arith.constant 0 : index
    %218 = vector.load %arg11[%c1, %c0_74, %c0_75] : memref<2x8x32xf32, #tpu.memory_space<vmem>>, vector<1x8x32xf32>
    %219 = vector.shape_cast %218 : vector<1x8x32xf32> to vector<8x32xf32>
    %c1_76 = arith.constant 1 : index
    %c0_77 = arith.constant 0 : index
    %c0_78 = arith.constant 0 : index
    %220 = vector.load %arg12[%c1_76, %c0_77, %c0_78] : memref<2x8x32xf32, #tpu.memory_space<vmem>>, vector<1x8x32xf32>
    %221 = vector.shape_cast %220 : vector<1x8x32xf32> to vector<8x32xf32>
    %c0_i32_79 = arith.constant 0 : i32
    %c8_i32_80 = arith.constant 8 : i32
    %222 = arith.muli %c0_i32_79, %c8_i32_80 : i32
    %223 = tpu.assume_multiple %222, 8 : i32
    %224 = arith.index_cast %223 : i32 to index
    %c0_81 = arith.constant 0 : index
    %225 = vector.load %arg14[%224, %c0_81] : memref<64x128xf32, #tpu.memory_space<vmem>>, vector<8x128xf32>
    %cst_82 = arith.constant dense<0.000000e+00> : vector<8x128xf32>
    %226 = tpu.matmul %219, %217, %cst_82 {dimension_numbers = #tpu.dot_dimension_numbers<[1], [0], [0], [1], [0, 0, 1, 1], [], []>} : vector<8x32xf32>, vector<32x128xf32>, vector<8x128xf32> -> vector<8x128xf32>
    %227 = arith.addf %225, %226 : vector<8x128xf32>
    %228 = arith.negf %227 : vector<8x128xf32>
    %229 = math.exp %228 : vector<8x128xf32>
    %cst_83 = arith.constant 1.000000e+00 : f32
    %230 = vector.broadcast %cst_83 : f32 to vector<8x128xf32>
    %231 = arith.addf %230, %229 : vector<8x128xf32>
    %232 = arith.divf %230, %231 : vector<8x128xf32>
    %233 = math.tanh %227 : vector<8x128xf32>
    %234 = vector.extract_strided_slice %232 {offsets = [0, 0], sizes = [8, 32], strides = [1, 1]} : vector<8x128xf32> to vector<8x32xf32>
    %235 = vector.extract_strided_slice %232 {offsets = [0, 32], sizes = [8, 32], strides = [1, 1]} : vector<8x128xf32> to vector<8x32xf32>
    %236 = vector.extract_strided_slice %233 {offsets = [0, 64], sizes = [8, 32], strides = [1, 1]} : vector<8x128xf32> to vector<8x32xf32>
    %237 = vector.extract_strided_slice %232 {offsets = [0, 96], sizes = [8, 32], strides = [1, 1]} : vector<8x128xf32> to vector<8x32xf32>
    %238 = arith.mulf %235, %221 : vector<8x32xf32>
    %239 = arith.mulf %234, %236 : vector<8x32xf32>
    %240 = arith.addf %238, %239 : vector<8x32xf32>
    %241 = math.tanh %240 : vector<8x32xf32>
    %242 = arith.mulf %237, %241 : vector<8x32xf32>
    %243 = arith.index_cast %223 : i32 to index
    %c0_84 = arith.constant 0 : index
    %244 = vector.load %arg13[%243, %c0_84] : memref<64x32xf32, #tpu.memory_space<vmem>>, vector<8x32xf32>
    tpu.vector_store %arg13[%243, %c0_84], %242 {strides = array<i32>} : memref<64x32xf32, #tpu.memory_space<vmem>>, vector<8x32xf32>,
    %c1_i32_85 = arith.constant 1 : i32
    %c8_i32_86 = arith.constant 8 : i32
    %245 = arith.muli %c1_i32_85, %c8_i32_86 : i32
    %246 = tpu.assume_multiple %245, 8 : i32
    %247 = arith.index_cast %246 : i32 to index
    %c0_87 = arith.constant 0 : index
    %248 = vector.load %arg14[%247, %c0_87] : memref<64x128xf32, #tpu.memory_space<vmem>>, vector<8x128xf32>
    %cst_88 = arith.constant dense<0.000000e+00> : vector<8x128xf32>
    %249 = tpu.matmul %242, %217, %cst_88 {dimension_numbers = #tpu.dot_dimension_numbers<[1], [0], [0], [1], [0, 0, 1, 1], [], []>} : vector<8x32xf32>, vector<32x128xf32>, vector<8x128xf32> -> vector<8x128xf32>
    %250 = arith.addf %248, %249 : vector<8x128xf32>
    %251 = arith.negf %250 : vector<8x128xf32>
    %252 = math.exp %251 : vector<8x128xf32>
    %cst_89 = arith.constant 1.000000e+00 : f32
    %253 = vector.broadcast %cst_89 : f32 to vector<8x128xf32>
    %254 = arith.addf %253, %252 : vector<8x128xf32>
    %255 = arith.divf %253, %254 : vector<8x128xf32>
    %256 = math.tanh %250 : vector<8x128xf32>
    %257 = vector.extract_strided_slice %255 {offsets = [0, 0], sizes = [8, 32], strides = [1, 1]} : vector<8x128xf32> to vector<8x32xf32>
    %258 = vector.extract_strided_slice %255 {offsets = [0, 32], sizes = [8, 32], strides = [1, 1]} : vector<8x128xf32> to vector<8x32xf32>
    %259 = vector.extract_strided_slice %256 {offsets = [0, 64], sizes = [8, 32], strides = [1, 1]} : vector<8x128xf32> to vector<8x32xf32>
    %260 = vector.extract_strided_slice %255 {offsets = [0, 96], sizes = [8, 32], strides = [1, 1]} : vector<8x128xf32> to vector<8x32xf32>
    %261 = arith.mulf %258, %240 : vector<8x32xf32>
    %262 = arith.mulf %257, %259 : vector<8x32xf32>
    %263 = arith.addf %261, %262 : vector<8x32xf32>
    %264 = math.tanh %263 : vector<8x32xf32>
    %265 = arith.mulf %260, %264 : vector<8x32xf32>
    %266 = arith.index_cast %246 : i32 to index
    %c0_90 = arith.constant 0 : index
    %267 = vector.load %arg13[%266, %c0_90] : memref<64x32xf32, #tpu.memory_space<vmem>>, vector<8x32xf32>
    tpu.vector_store %arg13[%266, %c0_90], %265 {strides = array<i32>} : memref<64x32xf32, #tpu.memory_space<vmem>>, vector<8x32xf32>,
    %c2_i32_91 = arith.constant 2 : i32
    %c8_i32_92 = arith.constant 8 : i32
    %268 = arith.muli %c2_i32_91, %c8_i32_92 : i32
    %269 = tpu.assume_multiple %268, 8 : i32
    %270 = arith.index_cast %269 : i32 to index
    %c0_93 = arith.constant 0 : index
    %271 = vector.load %arg14[%270, %c0_93] : memref<64x128xf32, #tpu.memory_space<vmem>>, vector<8x128xf32>
    %cst_94 = arith.constant dense<0.000000e+00> : vector<8x128xf32>
    %272 = tpu.matmul %265, %217, %cst_94 {dimension_numbers = #tpu.dot_dimension_numbers<[1], [0], [0], [1], [0, 0, 1, 1], [], []>} : vector<8x32xf32>, vector<32x128xf32>, vector<8x128xf32> -> vector<8x128xf32>
    %273 = arith.addf %271, %272 : vector<8x128xf32>
    %274 = arith.negf %273 : vector<8x128xf32>
    %275 = math.exp %274 : vector<8x128xf32>
    %cst_95 = arith.constant 1.000000e+00 : f32
    %276 = vector.broadcast %cst_95 : f32 to vector<8x128xf32>
    %277 = arith.addf %276, %275 : vector<8x128xf32>
    %278 = arith.divf %276, %277 : vector<8x128xf32>
    %279 = math.tanh %273 : vector<8x128xf32>
    %280 = vector.extract_strided_slice %278 {offsets = [0, 0], sizes = [8, 32], strides = [1, 1]} : vector<8x128xf32> to vector<8x32xf32>
    %281 = vector.extract_strided_slice %278 {offsets = [0, 32], sizes = [8, 32], strides = [1, 1]} : vector<8x128xf32> to vector<8x32xf32>
    %282 = vector.extract_strided_slice %279 {offsets = [0, 64], sizes = [8, 32], strides = [1, 1]} : vector<8x128xf32> to vector<8x32xf32>
    %283 = vector.extract_strided_slice %278 {offsets = [0, 96], sizes = [8, 32], strides = [1, 1]} : vector<8x128xf32> to vector<8x32xf32>
    %284 = arith.mulf %281, %263 : vector<8x32xf32>
    %285 = arith.mulf %280, %282 : vector<8x32xf32>
    %286 = arith.addf %284, %285 : vector<8x32xf32>
    %287 = math.tanh %286 : vector<8x32xf32>
    %288 = arith.mulf %283, %287 : vector<8x32xf32>
    %289 = arith.index_cast %269 : i32 to index
    %c0_96 = arith.constant 0 : index
    %290 = vector.load %arg13[%289, %c0_96] : memref<64x32xf32, #tpu.memory_space<vmem>>, vector<8x32xf32>
    tpu.vector_store %arg13[%289, %c0_96], %288 {strides = array<i32>} : memref<64x32xf32, #tpu.memory_space<vmem>>, vector<8x32xf32>,
    %c3_i32_97 = arith.constant 3 : i32
    %c8_i32_98 = arith.constant 8 : i32
    %291 = arith.muli %c3_i32_97, %c8_i32_98 : i32
    %292 = tpu.assume_multiple %291, 8 : i32
    %293 = arith.index_cast %292 : i32 to index
    %c0_99 = arith.constant 0 : index
    %294 = vector.load %arg14[%293, %c0_99] : memref<64x128xf32, #tpu.memory_space<vmem>>, vector<8x128xf32>
    %cst_100 = arith.constant dense<0.000000e+00> : vector<8x128xf32>
    %295 = tpu.matmul %288, %217, %cst_100 {dimension_numbers = #tpu.dot_dimension_numbers<[1], [0], [0], [1], [0, 0, 1, 1], [], []>} : vector<8x32xf32>, vector<32x128xf32>, vector<8x128xf32> -> vector<8x128xf32>
    %296 = arith.addf %294, %295 : vector<8x128xf32>
    %297 = arith.negf %296 : vector<8x128xf32>
    %298 = math.exp %297 : vector<8x128xf32>
    %cst_101 = arith.constant 1.000000e+00 : f32
    %299 = vector.broadcast %cst_101 : f32 to vector<8x128xf32>
    %300 = arith.addf %299, %298 : vector<8x128xf32>
    %301 = arith.divf %299, %300 : vector<8x128xf32>
    %302 = math.tanh %296 : vector<8x128xf32>
    %303 = vector.extract_strided_slice %301 {offsets = [0, 0], sizes = [8, 32], strides = [1, 1]} : vector<8x128xf32> to vector<8x32xf32>
    %304 = vector.extract_strided_slice %301 {offsets = [0, 32], sizes = [8, 32], strides = [1, 1]} : vector<8x128xf32> to vector<8x32xf32>
    %305 = vector.extract_strided_slice %302 {offsets = [0, 64], sizes = [8, 32], strides = [1, 1]} : vector<8x128xf32> to vector<8x32xf32>
    %306 = vector.extract_strided_slice %301 {offsets = [0, 96], sizes = [8, 32], strides = [1, 1]} : vector<8x128xf32> to vector<8x32xf32>
    %307 = arith.mulf %304, %286 : vector<8x32xf32>
    %308 = arith.mulf %303, %305 : vector<8x32xf32>
    %309 = arith.addf %307, %308 : vector<8x32xf32>
    %310 = math.tanh %309 : vector<8x32xf32>
    %311 = arith.mulf %306, %310 : vector<8x32xf32>
    %312 = arith.index_cast %292 : i32 to index
    %c0_102 = arith.constant 0 : index
    %313 = vector.load %arg13[%312, %c0_102] : memref<64x32xf32, #tpu.memory_space<vmem>>, vector<8x32xf32>
    tpu.vector_store %arg13[%312, %c0_102], %311 {strides = array<i32>} : memref<64x32xf32, #tpu.memory_space<vmem>>, vector<8x32xf32>,
    %c4_i32_103 = arith.constant 4 : i32
    %c8_i32_104 = arith.constant 8 : i32
    %314 = arith.muli %c4_i32_103, %c8_i32_104 : i32
    %315 = tpu.assume_multiple %314, 8 : i32
    %316 = arith.index_cast %315 : i32 to index
    %c0_105 = arith.constant 0 : index
    %317 = vector.load %arg14[%316, %c0_105] : memref<64x128xf32, #tpu.memory_space<vmem>>, vector<8x128xf32>
    %cst_106 = arith.constant dense<0.000000e+00> : vector<8x128xf32>
    %318 = tpu.matmul %311, %217, %cst_106 {dimension_numbers = #tpu.dot_dimension_numbers<[1], [0], [0], [1], [0, 0, 1, 1], [], []>} : vector<8x32xf32>, vector<32x128xf32>, vector<8x128xf32> -> vector<8x128xf32>
    %319 = arith.addf %317, %318 : vector<8x128xf32>
    %320 = arith.negf %319 : vector<8x128xf32>
    %321 = math.exp %320 : vector<8x128xf32>
    %cst_107 = arith.constant 1.000000e+00 : f32
    %322 = vector.broadcast %cst_107 : f32 to vector<8x128xf32>
    %323 = arith.addf %322, %321 : vector<8x128xf32>
    %324 = arith.divf %322, %323 : vector<8x128xf32>
    %325 = math.tanh %319 : vector<8x128xf32>
    %326 = vector.extract_strided_slice %324 {offsets = [0, 0], sizes = [8, 32], strides = [1, 1]} : vector<8x128xf32> to vector<8x32xf32>
    %327 = vector.extract_strided_slice %324 {offsets = [0, 32], sizes = [8, 32], strides = [1, 1]} : vector<8x128xf32> to vector<8x32xf32>
    %328 = vector.extract_strided_slice %325 {offsets = [0, 64], sizes = [8, 32], strides = [1, 1]} : vector<8x128xf32> to vector<8x32xf32>
    %329 = vector.extract_strided_slice %324 {offsets = [0, 96], sizes = [8, 32], strides = [1, 1]} : vector<8x128xf32> to vector<8x32xf32>
    %330 = arith.mulf %327, %309 : vector<8x32xf32>
    %331 = arith.mulf %326, %328 : vector<8x32xf32>
    %332 = arith.addf %330, %331 : vector<8x32xf32>
    %333 = math.tanh %332 : vector<8x32xf32>
    %334 = arith.mulf %329, %333 : vector<8x32xf32>
    %335 = arith.index_cast %315 : i32 to index
    %c0_108 = arith.constant 0 : index
    %336 = vector.load %arg13[%335, %c0_108] : memref<64x32xf32, #tpu.memory_space<vmem>>, vector<8x32xf32>
    tpu.vector_store %arg13[%335, %c0_108], %334 {strides = array<i32>} : memref<64x32xf32, #tpu.memory_space<vmem>>, vector<8x32xf32>,
    %c5_i32_109 = arith.constant 5 : i32
    %c8_i32_110 = arith.constant 8 : i32
    %337 = arith.muli %c5_i32_109, %c8_i32_110 : i32
    %338 = tpu.assume_multiple %337, 8 : i32
    %339 = arith.index_cast %338 : i32 to index
    %c0_111 = arith.constant 0 : index
    %340 = vector.load %arg14[%339, %c0_111] : memref<64x128xf32, #tpu.memory_space<vmem>>, vector<8x128xf32>
    %cst_112 = arith.constant dense<0.000000e+00> : vector<8x128xf32>
    %341 = tpu.matmul %334, %217, %cst_112 {dimension_numbers = #tpu.dot_dimension_numbers<[1], [0], [0], [1], [0, 0, 1, 1], [], []>} : vector<8x32xf32>, vector<32x128xf32>, vector<8x128xf32> -> vector<8x128xf32>
    %342 = arith.addf %340, %341 : vector<8x128xf32>
    %343 = arith.negf %342 : vector<8x128xf32>
    %344 = math.exp %343 : vector<8x128xf32>
    %cst_113 = arith.constant 1.000000e+00 : f32
    %345 = vector.broadcast %cst_113 : f32 to vector<8x128xf32>
    %346 = arith.addf %345, %344 : vector<8x128xf32>
    %347 = arith.divf %345, %346 : vector<8x128xf32>
    %348 = math.tanh %342 : vector<8x128xf32>
    %349 = vector.extract_strided_slice %347 {offsets = [0, 0], sizes = [8, 32], strides = [1, 1]} : vector<8x128xf32> to vector<8x32xf32>
    %350 = vector.extract_strided_slice %347 {offsets = [0, 32], sizes = [8, 32], strides = [1, 1]} : vector<8x128xf32> to vector<8x32xf32>
    %351 = vector.extract_strided_slice %348 {offsets = [0, 64], sizes = [8, 32], strides = [1, 1]} : vector<8x128xf32> to vector<8x32xf32>
    %352 = vector.extract_strided_slice %347 {offsets = [0, 96], sizes = [8, 32], strides = [1, 1]} : vector<8x128xf32> to vector<8x32xf32>
    %353 = arith.mulf %350, %332 : vector<8x32xf32>
    %354 = arith.mulf %349, %351 : vector<8x32xf32>
    %355 = arith.addf %353, %354 : vector<8x32xf32>
    %356 = math.tanh %355 : vector<8x32xf32>
    %357 = arith.mulf %352, %356 : vector<8x32xf32>
    %358 = arith.index_cast %338 : i32 to index
    %c0_114 = arith.constant 0 : index
    %359 = vector.load %arg13[%358, %c0_114] : memref<64x32xf32, #tpu.memory_space<vmem>>, vector<8x32xf32>
    tpu.vector_store %arg13[%358, %c0_114], %357 {strides = array<i32>} : memref<64x32xf32, #tpu.memory_space<vmem>>, vector<8x32xf32>,
    %c6_i32_115 = arith.constant 6 : i32
    %c8_i32_116 = arith.constant 8 : i32
    %360 = arith.muli %c6_i32_115, %c8_i32_116 : i32
    %361 = tpu.assume_multiple %360, 8 : i32
    %362 = arith.index_cast %361 : i32 to index
    %c0_117 = arith.constant 0 : index
    %363 = vector.load %arg14[%362, %c0_117] : memref<64x128xf32, #tpu.memory_space<vmem>>, vector<8x128xf32>
    %cst_118 = arith.constant dense<0.000000e+00> : vector<8x128xf32>
    %364 = tpu.matmul %357, %217, %cst_118 {dimension_numbers = #tpu.dot_dimension_numbers<[1], [0], [0], [1], [0, 0, 1, 1], [], []>} : vector<8x32xf32>, vector<32x128xf32>, vector<8x128xf32> -> vector<8x128xf32>
    %365 = arith.addf %363, %364 : vector<8x128xf32>
    %366 = arith.negf %365 : vector<8x128xf32>
    %367 = math.exp %366 : vector<8x128xf32>
    %cst_119 = arith.constant 1.000000e+00 : f32
    %368 = vector.broadcast %cst_119 : f32 to vector<8x128xf32>
    %369 = arith.addf %368, %367 : vector<8x128xf32>
    %370 = arith.divf %368, %369 : vector<8x128xf32>
    %371 = math.tanh %365 : vector<8x128xf32>
    %372 = vector.extract_strided_slice %370 {offsets = [0, 0], sizes = [8, 32], strides = [1, 1]} : vector<8x128xf32> to vector<8x32xf32>
    %373 = vector.extract_strided_slice %370 {offsets = [0, 32], sizes = [8, 32], strides = [1, 1]} : vector<8x128xf32> to vector<8x32xf32>
    %374 = vector.extract_strided_slice %371 {offsets = [0, 64], sizes = [8, 32], strides = [1, 1]} : vector<8x128xf32> to vector<8x32xf32>
    %375 = vector.extract_strided_slice %370 {offsets = [0, 96], sizes = [8, 32], strides = [1, 1]} : vector<8x128xf32> to vector<8x32xf32>
    %376 = arith.mulf %373, %355 : vector<8x32xf32>
    %377 = arith.mulf %372, %374 : vector<8x32xf32>
    %378 = arith.addf %376, %377 : vector<8x32xf32>
    %379 = math.tanh %378 : vector<8x32xf32>
    %380 = arith.mulf %375, %379 : vector<8x32xf32>
    %381 = arith.index_cast %361 : i32 to index
    %c0_120 = arith.constant 0 : index
    %382 = vector.load %arg13[%381, %c0_120] : memref<64x32xf32, #tpu.memory_space<vmem>>, vector<8x32xf32>
    tpu.vector_store %arg13[%381, %c0_120], %380 {strides = array<i32>} : memref<64x32xf32, #tpu.memory_space<vmem>>, vector<8x32xf32>,
    %c7_i32_121 = arith.constant 7 : i32
    %c8_i32_122 = arith.constant 8 : i32
    %383 = arith.muli %c7_i32_121, %c8_i32_122 : i32
    %384 = tpu.assume_multiple %383, 8 : i32
    %385 = arith.index_cast %384 : i32 to index
    %c0_123 = arith.constant 0 : index
    %386 = vector.load %arg14[%385, %c0_123] : memref<64x128xf32, #tpu.memory_space<vmem>>, vector<8x128xf32>
    %cst_124 = arith.constant dense<0.000000e+00> : vector<8x128xf32>
    %387 = tpu.matmul %380, %217, %cst_124 {dimension_numbers = #tpu.dot_dimension_numbers<[1], [0], [0], [1], [0, 0, 1, 1], [], []>} : vector<8x32xf32>, vector<32x128xf32>, vector<8x128xf32> -> vector<8x128xf32>
    %388 = arith.addf %386, %387 : vector<8x128xf32>
    %389 = arith.negf %388 : vector<8x128xf32>
    %390 = math.exp %389 : vector<8x128xf32>
    %cst_125 = arith.constant 1.000000e+00 : f32
    %391 = vector.broadcast %cst_125 : f32 to vector<8x128xf32>
    %392 = arith.addf %391, %390 : vector<8x128xf32>
    %393 = arith.divf %391, %392 : vector<8x128xf32>
    %394 = math.tanh %388 : vector<8x128xf32>
    %395 = vector.extract_strided_slice %393 {offsets = [0, 0], sizes = [8, 32], strides = [1, 1]} : vector<8x128xf32> to vector<8x32xf32>
    %396 = vector.extract_strided_slice %393 {offsets = [0, 32], sizes = [8, 32], strides = [1, 1]} : vector<8x128xf32> to vector<8x32xf32>
    %397 = vector.extract_strided_slice %394 {offsets = [0, 64], sizes = [8, 32], strides = [1, 1]} : vector<8x128xf32> to vector<8x32xf32>
    %398 = vector.extract_strided_slice %393 {offsets = [0, 96], sizes = [8, 32], strides = [1, 1]} : vector<8x128xf32> to vector<8x32xf32>
    %399 = arith.mulf %396, %378 : vector<8x32xf32>
    %400 = arith.mulf %395, %397 : vector<8x32xf32>
    %401 = arith.addf %399, %400 : vector<8x32xf32>
    %402 = math.tanh %401 : vector<8x32xf32>
    %403 = arith.mulf %398, %402 : vector<8x32xf32>
    %404 = arith.index_cast %384 : i32 to index
    %c0_126 = arith.constant 0 : index
    %405 = vector.load %arg13[%404, %c0_126] : memref<64x32xf32, #tpu.memory_space<vmem>>, vector<8x32xf32>
    tpu.vector_store %arg13[%404, %c0_126], %403 {strides = array<i32>} : memref<64x32xf32, #tpu.memory_space<vmem>>, vector<8x32xf32>,
    %c8_i32_127 = arith.constant 8 : i32
    %c1_128 = arith.constant 1 : index
    %c0_129 = arith.constant 0 : index
    %c0_130 = arith.constant 0 : index
    %406 = vector.load %arg11[%c1_128, %c0_129, %c0_130] : memref<2x8x32xf32, #tpu.memory_space<vmem>>, vector<1x8x32xf32>
    %407 = vector.shape_cast %406 : vector<1x8x32xf32> to vector<8x32xf32>
    %408 = vector.shape_cast %403 : vector<8x32xf32> to vector<1x8x32xf32>
    tpu.vector_store %arg11[%c1_128, %c0_129, %c0_130], %408 {strides = array<i32>} : memref<2x8x32xf32, #tpu.memory_space<vmem>>, vector<1x8x32xf32>,
    %c1_131 = arith.constant 1 : index
    %c0_132 = arith.constant 0 : index
    %c0_133 = arith.constant 0 : index
    %409 = vector.load %arg12[%c1_131, %c0_132, %c0_133] : memref<2x8x32xf32, #tpu.memory_space<vmem>>, vector<1x8x32xf32>
    %410 = vector.shape_cast %409 : vector<1x8x32xf32> to vector<8x32xf32>
    %411 = vector.shape_cast %401 : vector<8x32xf32> to vector<1x8x32xf32>
    tpu.vector_store %arg12[%c1_131, %c0_132, %c0_133], %411 {strides = array<i32>} : memref<2x8x32xf32, #tpu.memory_space<vmem>>, vector<1x8x32xf32>,
    %c0_134 = arith.constant 0 : index
    %c0_135 = arith.constant 0 : index
    %412 = vector.load %arg13[%c0_134, %c0_135] : memref<64x32xf32, #tpu.memory_space<vmem>>, vector<64x32xf32>
    %c0_136 = arith.constant 0 : index
    %c0_137 = arith.constant 0 : index
    %413 = vector.load %arg8[%c0_136, %c0_137] : memref<32x128xf32, #tpu.memory_space<vmem>>, vector<32x128xf32>
    %cst_138 = arith.constant dense<0.000000e+00> : vector<64x128xf32>
    %414 = tpu.matmul %412, %413, %cst_138 {dimension_numbers = #tpu.dot_dimension_numbers<[1], [0], [0], [1], [0, 0, 1, 1], [], []>} : vector<64x32xf32>, vector<32x128xf32>, vector<64x128xf32> -> vector<64x128xf32>
    %c0_139 = arith.constant 0 : index
    %c0_140 = arith.constant 0 : index
    %415 = vector.load %arg9[%c0_139, %c0_140] : memref<1x128xf32, #tpu.memory_space<vmem>>, vector<1x128xf32>
    %416 = vector.broadcast %415 : vector<1x128xf32> to vector<64x128xf32>
    %417 = arith.addf %414, %416 : vector<64x128xf32>
    %418 = arith.negf %417 : vector<64x128xf32>
    %419 = math.exp %418 : vector<64x128xf32>
    %cst_141 = arith.constant 1.000000e+00 : f32
    %420 = vector.broadcast %cst_141 : f32 to vector<64x128xf32>
    %421 = arith.addf %420, %419 : vector<64x128xf32>
    %422 = arith.divf %420, %421 : vector<64x128xf32>
    %c0_142 = arith.constant 0 : index
    %c0_143 = arith.constant 0 : index
    %423 = vector.load %arg10[%c0_142, %c0_143] : memref<64x128xf32, #tpu.memory_space<vmem>>, vector<64x128xf32>
    tpu.vector_store %arg10[%c0_142, %c0_143], %422 {strides = array<i32>} : memref<64x128xf32, #tpu.memory_space<vmem>>, vector<64x128xf32>,
    return
  }
  func.func @transform_0(%arg0: i32) -> (i32, i32) {
    %c0_i32 = arith.constant 0 : i32
    %c0_i32_0 = arith.constant 0 : i32
    return %arg0, %c0_i32 : i32, i32
  }
  func.func @transform_1(%arg0: i32) -> (i32, i32) {
    %c0_i32 = arith.constant 0 : i32
    %c0_i32_0 = arith.constant 0 : i32
    %c0_i32_1 = arith.constant 0 : i32
    return %c0_i32, %c0_i32_0 : i32, i32
  }
  func.func @transform_2(%arg0: i32) -> (i32, i32) {
    %c0_i32 = arith.constant 0 : i32
    %c0_i32_0 = arith.constant 0 : i32
    %c0_i32_1 = arith.constant 0 : i32
    return %c0_i32, %c0_i32_0 : i32, i32
  }
  func.func @transform_3(%arg0: i32) -> (i32, i32) {
    %c0_i32 = arith.constant 0 : i32
    %c0_i32_0 = arith.constant 0 : i32
    %c0_i32_1 = arith.constant 0 : i32
    return %c0_i32, %c0_i32_0 : i32, i32
  }
  func.func @transform_4(%arg0: i32) -> (i32, i32) {
    %c0_i32 = arith.constant 0 : i32
    %c0_i32_0 = arith.constant 0 : i32
    %c0_i32_1 = arith.constant 0 : i32
    return %c0_i32, %c0_i32_0 : i32, i32
  }
  func.func @transform_5(%arg0: i32) -> (i32, i32) {
    %c0_i32 = arith.constant 0 : i32
    %c0_i32_0 = arith.constant 0 : i32
    %c0_i32_1 = arith.constant 0 : i32
    return %c0_i32, %c0_i32_0 : i32, i32
  }
  func.func @transform_6(%arg0: i32) -> (i32, i32) {
    %c0_i32 = arith.constant 0 : i32
    %c0_i32_0 = arith.constant 0 : i32
    %c0_i32_1 = arith.constant 0 : i32
    return %c0_i32, %c0_i32_0 : i32, i32
  }
  func.func @transform_7(%arg0: i32) -> (i32, i32) {
    %c0_i32 = arith.constant 0 : i32
    %c0_i32_0 = arith.constant 0 : i32
    %c0_i32_1 = arith.constant 0 : i32
    return %c0_i32, %c0_i32_0 : i32, i32
  }
  func.func @transform_8(%arg0: i32) -> (i32, i32) {
    %c0_i32 = arith.constant 0 : i32
    %c0_i32_0 = arith.constant 0 : i32
    %c0_i32_1 = arith.constant 0 : i32
    return %c0_i32, %c0_i32_0 : i32, i32
  }
  func.func @transform_9(%arg0: i32) -> (i32, i32) {
    %c0_i32 = arith.constant 0 : i32
    %c0_i32_0 = arith.constant 0 : i32
    return %arg0, %c0_i32 : i32, i32
  }
}

</mosaic_0001>

<bundles_post_ra>
// kernel: dkt_forward.1
= control target key start
LH: loop header
LB: loop body
LE: loop exit
PB: predicated region body
PF: predicated region fallthrough
CT: control target
= control target key end

     0   :  { %s3471_s30 = smov 0   ;;  %s3897_s0 = inlined_call_operand.vmem [shape: s32[128,1], index: 0, kind: input, shape index: {}]   ;;  %s3898_s1 = inlined_call_operand.vmem [shape: f32[18,128], index: 1, kind: input, shape index: {}]   ;;  %s3899_s2 = inlined_call_operand.vmem [shape: f32[32,128], index: 2, kind: input, shape index: {}]   ;;  %s3900_s3 = inlined_call_operand.vmem [shape: f32[1,128], index: 3, kind: input, shape index: {}]   ;;  %s3901_s4 = inlined_call_operand.vmem [shape: f32[32,128], index: 4, kind: input, shape index: {}]   ;;  %s3902_s5 = inlined_call_operand.vmem [shape: f32[32,128], index: 5, kind: input, shape index: {}]   ;;  %s3903_s6 = inlined_call_operand.vmem [shape: f32[1,128], index: 6, kind: input, shape index: {}]   ;;  %s3904_s7 = inlined_call_operand.vmem [shape: f32[32,128], index: 7, kind: input, shape index: {}]   ;;  %s3905_s8 = inlined_call_operand.vmem [shape: f32[1,128], index: 8, kind: input, shape index: {}]   ;;  %s3906_s9 = inlined_call_operand.vmem [shape: f32[128,128], index: 9, kind: output, shape index: {}]  }
   0x1 LB: > { %s2670_s10 = sadd.s32 4294967295, %s3411_s30   ;;  %p2674_p0 = scmp.ge.s32.totalorder %s3411_s30, 1  ;;  %s3411_s30 = sphi %s3471_s30, %s19_s30  }
   0x2   : > { %p288_p1 = scmp.lt.s32.totalorder %s3411_s30, 3 }
   0x4   : > { %p289_p2 = pnand %p2674_p0, %p288_p1 }
   0x5   : > { %s2675_s11 = sshll.u32 (!%p289_p2), %s2670_s10, 3  ;;  %p2679_p4 = scmp.ne.s32.totalorder (!%p289_p2), %s2670_s10, 0 }
   0x6   : > { %292 = sbr.rel (%p289_p2) target bundleno = 10952 (0x2ac8), region = 56  ;;  %p325_p3 = scmp.lt.s32.totalorder (!%p289_p2), %s2675_s11, 15 }
   0xd   : > { %s3908_s11 = smov (!%p325_p3, %s2675_s11), 15  ;;  %339 = sbr.rel (%p2679_p4) target bundleno = 20 (0x14), region = 60 }
   0xe   : > { %s2676_s12 = sshll.u32 %s3908_s11, 3  ;;  %vm340_vm0 = vcmask (!%p2679_p4), 261120   ;;  %v3413_v0 = vmov (!%p2679_p4), 0.0  }
   0xf   : > { %s3482_s15 = scalar_lea.vmem %s3897_s0, %s2676_s12  ;;  %s3487_s18 = scalar_lea.vmem %s3906_s9, %s2676_s12  ;;  %341 = vst.msk [vmem:[#allocation2] sm:$0xff] (!%p2679_p4), %vm340_vm0, %v3413_v0  ;;  %342 = vst.msk [vmem:[#allocation2 + $0x8] sm:$0xff] (!%p2679_p4), %vm340_vm0, %v3413_v0 }
  0x10   : > { %343 = vst.msk [vmem:[#allocation3] sm:$0xff] (!%p2679_p4), %vm340_vm0, %v3413_v0  ;;  %344 = vst.msk [vmem:[#allocation3 + $0x8] sm:$0xff] (!%p2679_p4), %vm340_vm0, %v3413_v0 }
  0x14 PF: > { %v351_v1 = vld [vmem:[%s3482_s15 + $0x30] sm:$0xff]  ;;  %v349_v2 = vld [vmem:[%s3482_s15 + $0x20] sm:$0xff]  ;;  %v3414_v3 = vmov 0   ;;  %v404_v5 = vld [vmem:[%s3898_s1 + $0x8] sm:$0xff]  ;;  %vm438_vm1 = vcmask 1041408   ;;  %v3415_v12 = vmov 0.0|0.0   ;;  %v353_v14 = vlaneseq }
  0x15   : > { %3244 = vset.pattern.permute.xlu1 %v3414_v3  ;;  %3243 = vset.pattern.permute.xlu0 %v3414_v3  ;;  %v403_v4 = vld [vmem:[%s3898_s1] sm:$0xff]  ;;  %v350_v6 = vld [vmem:[%s3482_s15 + $0x28] sm:$0xff]  ;;  %v405_v9 = vld [vmem:[%s3898_s1 + $0x10] sm:$0x3]  ;;  %s3416_s25 = smov 32   ;;  %vm413_vm2 = vcmask 146432  }
  0x16   : > { %374 = vperm.xlu1 %3244, %v351_v1   ;;  %368 = vperm.xlu0 %3243, %v349_v2   ;;  %v345_v7 = vld [vmem:[%s3482_s15] sm:$0xff]  ;;  %v3107_v8 = vpack.c.bf16 %v404_v5, %v403_v4  ;;  %v352_v10 = vld [vmem:[%s3482_s15 + $0x38] sm:$0xff]  ;;  %v346_v11 = vld [vmem:[%s3482_s15 + $0x8] sm:$0xff]  ;;  %v3507_v15 = vand.u32 127, %v353_v14  ;;  %v3417_v20 = vmov 0.0   ;;  %vm3418_vm9 = vmmov 0  }
  0x17   : > { %v560_v13 = vld [vmem:[#allocation3] sm:$0xff]  ;;  %v555_v18 = vld [vmem:[%s3899_s2] sm:$0xff]  ;;  %v556_v19 = vld [vmem:[%s3899_s2 + $0x8] sm:$0xff]  ;;  %vm562_vm10 = vcmask 261120   ;;  %s3419_s17 = smov 64   ;;  %s3420_s10 = smov 96  }
  0x18   : > { %3223 = vmatprep.subr.bf16.mxu1 %v3107_v8  ;;  %3108 = vmatprep.subr.bf16.mxu0 %v3107_v8  ;;  %v3519_v24 = vpack.c.bf16 %v556_v19, %v555_v18  ;;  %v557_v25 = vld [vmem:[%s3899_s2 + $0x10] sm:$0xff]  ;;  %v558_v26 = vld [vmem:[%s3899_s2 + $0x18] sm:$0xff]  ;;  %v559_v35 = vld [vmem:[#allocation2] sm:$0xff] }
  0x19   : > { %3225 = vmatpush3.bf16.msra.mxu1 %v3107_v8  ;;  %3110 = vmatpush3.bf16.msra.mxu0 %v3107_v8  ;;  %v3536_v32 = vpack.c.bf16 %v558_v26, %v557_v25  ;;  %v3569_v40 = vld [vmem:[%s3900_s3] ss:$0 sm:$0xff] }
  0x1a   : > { %371 = vperm.xlu0 %3243, %v350_v6   ;;  %356 = vperm.xlu1 %3244, %v345_v7  }
  0x1b   : > { %3224 = vmatprep.subr.msk.mxu1 %vm438_vm1, %v405_v9  ;;  %2877 = vmatprep.subr.msk.mxu0 %vm438_vm1, %v405_v9 }
  0x1d   : > { %3226 = vmatpush3.msk.msra.mxu1 %vm438_vm1, %v405_v9  ;;  %2878 = vmatpush3.msk.msra.mxu0 %vm438_vm1, %v405_v9  ;;  %v347_v9 = vld [vmem:[%s3482_s15 + $0x10] sm:$0xff] }
  0x1e   : > { %377 = vperm.xlu0 %3243, %v352_v10   ;;  %359 = vperm.xlu1 %3244, %v346_v11  }
  0x1f   : > { %3111 = vmatprep.subr.bf16.mxu1 %v3415_v12  ;;  %3123 = vmatprep.subr.bf16.mxu0 %v3415_v12 }
  0x22   : > { %645 = vrot.lane.b32.xlu1 %v560_v13, %s3416_s25 }
  0x95   : > { %v375_v16 = vpop.permute.xlu1 %374  ;;  %v369_v17 = vpop.permute.xlu0 %368 }
  0x96   : > { %vm383_vm3 = vcmp.eq.s32.totalorder %v369_v17, %v3507_v15  ;;  %vm385_vm4 = vcmp.eq.s32.totalorder %v375_v16, %v3507_v15  ;;  %v348_v16 = vld [vmem:[%s3482_s15 + $0x18] sm:$0xff] }
  0x97   : > { %v2684_v21 = vsel %vm383_vm3, 1.0, %v3417_v20  ;;  %v2686_v29 = vsel %vm385_vm4, 1.0, %v3417_v20 }
  0x98   : > { %2885 = vmatprep.mubr.msk.f32.mxu1 %vm413_vm2, %v2684_v21 }
  0x99   : > { %v372_v22 = vpop.permute.xlu0 %371  ;;  %v357_v23 = vpop.permute.xlu1 %356 }
  0x9a   : > { %vm384_vm5 = vcmp.eq.s32.totalorder %v372_v22, %v3507_v15  ;;  %vm379_vm6 = vcmp.eq.s32.totalorder %v357_v23, %v3507_v15 }
  0x9b   : > { %v2685_v27 = vsel %vm384_vm5, 1.0, %v3417_v20  ;;  %v2680_v28 = vsel %vm379_vm6, 1.0, %v3417_v20 }
  0x9c   : > { %2879 = vmatprep.mubr.msk.f32.mxu0 %vm413_vm2, %v2680_v28  ;;  %2886 = vmatmul.mubr.msk.f32.vlgmr.msra.gmra.mrb[0].mxu1 %vm413_vm2, %v2685_v27 }
  0x9d   : > { %3113 = vmatpush3.bf16.msra.mxu1 %v3519_v24  ;;  %2888 = vmatprep.mubr.msk.f32.mxu1 %vm413_vm2, %v2686_v29  ;;  %v378_v30 = vpop.permute.xlu0 %377  ;;  %v360_v31 = vpop.permute.xlu1 %359 }
  0x9e   : > { %vm386_vm7 = vcmp.eq.s32.totalorder %v378_v30, %v3507_v15  ;;  %vm380_vm8 = vcmp.eq.s32.totalorder %v360_v31, %v3507_v15  ;;  %3114 = vmatprep.subr.bf16.mxu1 %v3415_v12 }
  0x9f   : > { %v2687_v33 = vsel %vm386_vm7, 1.0, %v3417_v20  ;;  %v2681_v34 = vsel %vm380_vm8, 1.0, %v3417_v20 }
  0xa0   : > { %2880 = vmatmul.mubr.msk.f32.vlgmr.msra.gmra.mrb[0].mxu0 %vm413_vm2, %v2681_v34  ;;  %2889 = vmatmul.mubr.msk.f32.gmra.mrb[2].mxu1 %vm413_vm2, %v2687_v33 }
  0xa1   : > { %3116 = vmatpush3.bf16.msra.mxu1 %v3536_v32  ;;  %2899 = vmatprep.mubr.msk.f32.mxu1 %vm3418_vm9, %v3417_v20  ;;  %v646_v54 = vpop.permute.xlu1 %645 }
  0xa2   : > { %3117 = vmatprep.subr.bf16.mxu1 %v3415_v12  ;;  %3125 = vmatpush3.bf16.msra.mxu0 %v3519_v24 }
  0xa3   : > { %3126 = vmatprep.subr.bf16.mxu0 %v3415_v12 }
  0xa4   : > { %2900 = vmatmul.mubr.msk.f32.vlgmr.msra.gmra.mrb[4].mxu1 %vm562_vm10, %v559_v35 }
  0xa5   : > { %3119 = vmatpush3.bf16.msra.mxu1 %v3519_v24  ;;  %2910 = vmatprep.mubr.msk.f32.mxu1 %vm3418_vm9, %v3417_v20 }
  0xa6   : > { %3120 = vmatprep.subr.bf16.mxu1 %v3415_v12  ;;  %3128 = vmatpush3.bf16.msra.mxu0 %v3536_v32 }
  0xa7   : > { %3135 = vmatprep.subr.bf16.mxu0 %v3415_v12 }
  0xa9   : > { %3122 = vmatpush3.bf16.msra.mxu1 %v3536_v32 }
  0xaa   : > { %3129 = vmatprep.subr.bf16.mxu1 %v3415_v12 }
 0x16f   : > { %v3560_v36 = vpop.f32.mrb[0].mxu1 }
 0x170   : > { %v3562_v37 = vpop.f32.mrb[1].mxu1 }
 0x173   : > { %v2881_v38 = vpop.f32.mrb[0].mxu0  ;;  %v3564_v39 = vpop.f32.mrb[2].mxu1 }
 0x174   : > { %v508_v41 = vpop.f32.mrb[1].mxu0  ;;  %v3571_v42 = vpop.f32.mrb[3].mxu1  ;;  %v514_v62 = vadd.f32 %v2881_v38, %v3569_v40 }
 0x175   : > { %v509_v43 = vadd.f32 %v3569_v40, %v508_v41 }
 0x177   : > { %v632_v44 = vpop.f32.mrb[4].mxu1 }
 0x178   : > { %v636_v45 = vadd.f32 %v632_v44, %v509_v43  ;;  %v2901_v46 = vpop.f32.mrb[5].mxu1 }
 0x17a   : > { %3245 = vtanh.f32 %v636_v45  ;;  %v2699_v48 = vmul.f32 -1.442695, %v636_v45 }
 0x17c   : > { %3247 = vpow2.f32 %v2699_v48 }
 0x184   : > { %v3246_v47 = vpop.eup %3245 }
 0x185   : > { %650 = vrot.lane.b32.xlu0 %v3246_v47, %s3419_s17 }
 0x186   : > { %v3248_v49 = vpop.eup %3247 }
 0x187   : > { %v640_v50 = vadd.f32 1.0, %v3248_v49 }
 0x189   : > { %3249 = vrcp.f32 %v640_v50 }
 0x193   : > { %v3250_v51 = vpop.eup %3249 }
 0x194   : > { %v648_v55 = vmul.f32 %v3250_v51, %v646_v54 }
 0x1f7   : > { %v651_v52 = vpop.permute.xlu0 %650 }
 0x1f8   : > { %v653_v53 = vmul.f32 %v3250_v51, %v651_v52 }
 0x1fa   : > { %655 = vrot.lane.b32.xlu0 %v653_v53, %s3416_s25 }
 0x26c   : > { %v656_v56 = vpop.permute.xlu0 %655 }
 0x26d   : > { %v658_v57 = vadd.f32 %v656_v56, %v648_v55 }
 0x26f   : > { %3251 = vtanh.f32 %v658_v57 }
 0x279   : > { %v3252_v58 = vpop.eup %3251 }
 0x27a   : > { %661 = vrot.lane.b32.xlu1 %v3252_v58, %s3419_s17 }
 0x2ec   : > { %v662_v59 = vpop.permute.xlu1 %661 }
 0x2ed   : > { %v664_v60 = vmul.f32 %v3250_v51, %v662_v59 }
 0x2ef   : > { %666 = vrot.lane.b32.xlu0 %v664_v60, %s3416_s25 }
 0x361   : > { %v667_v61 = vpop.permute.xlu0 %666 }
 0x362   : > { %669 = vst.msk [vmem:[#allocation4] sm:$0xff] %vm562_vm10, %v667_v61  ;;  %2911 = vmatmul.mubr.msk.f32.vlgmr.msra.gmra.mrb[6].mxu1 %vm562_vm10, %v667_v61 }
 0x363   : > { %3131 = vmatpush3.bf16.msra.mxu1 %v3519_v24  ;;  %2932 = vmatprep.mubr.msk.f32.mxu1 %vm3418_vm9, %v3417_v20 }
 0x364   : > { %3132 = vmatprep.subr.bf16.mxu1 %v3415_v12 }
 0x367   : > { %3134 = vmatpush3.bf16.msra.mxu1 %v3536_v32 }
 0x368   : > { %3141 = vmatprep.subr.bf16.mxu1 %v3415_v12 }
 0x435   : > { %v740_v63 = vpop.f32.mrb[6].mxu1 }
 0x436   : > { %v744_v0 = vadd.f32 %v740_v63, %v514_v62  ;;  %v2912_v1 = vpop.f32.mrb[7].mxu1 }
 0x438   : > { %3253 = vtanh.f32 %v744_v0  ;;  %v2701_v3 = vmul.f32 -1.442695, %v744_v0 }
 0x43a   : > { %3255 = vpow2.f32 %v2701_v3 }
 0x442   : > { %v3254_v2 = vpop.eup %3253 }
 0x443   : > { %754 = vrot.lane.b32.xlu1 %v3254_v2, %s3419_s17 }
 0x444   : > { %v3256_v4 = vpop.eup %3255 }
 0x445   : > { %v748_v5 = vadd.f32 1.0, %v3256_v4 }
 0x447   : > { %3257 = vrcp.f32 %v748_v5  ;;  %v529_v5 = vadd.f32 %v3569_v40, %v3562_v37 }
 0x451   : > { %v3258_v6 = vpop.eup %3257 }
 0x452   : > { %v752_v10 = vmul.f32 %v3258_v6, %v658_v57 }
 0x4b5   : > { %v755_v7 = vpop.permute.xlu1 %754 }
 0x4b6   : > { %v757_v8 = vmul.f32 %v3258_v6, %v755_v7 }
 0x4b8   : > { %759 = vrot.lane.b32.xlu0 %v757_v8, %s3416_s25 }
 0x4bc   : > { %362 = vperm.xlu0 %3243, %v347_v9  }
 0x52a   : > { %v760_v11 = vpop.permute.xlu0 %759 }
 0x52b   : > { %v762_v13 = vadd.f32 %v760_v11, %v752_v10 }
 0x52d   : > { %3259 = vtanh.f32 %v762_v13 }
 0x537   : > { %v3260_v14 = vpop.eup %3259 }
 0x538   : > { %765 = vrot.lane.b32.xlu1 %v3260_v14, %s3419_s17 }
 0x53b   : > { %v363_v17 = vpop.permute.xlu0 %362 }
 0x53c   : > { %vm381_vm11 = vcmp.eq.s32.totalorder %v363_v17, %v3507_v15  ;;  %365 = vperm.xlu1 %3244, %v348_v16  }
 0x53d   : > { %v2682_v18 = vsel %vm381_vm11, 1.0, %v3417_v20 }
 0x53e   : > { %2882 = vmatprep.mubr.msk.f32.mxu0 %vm413_vm2, %v2682_v18 }
 0x5aa   : > { %v766_v19 = vpop.permute.xlu1 %765 }
 0x5ab   : > { %v768_v21 = vmul.f32 %v3258_v6, %v766_v19 }
 0x5ad   : > { %770 = vrot.lane.b32.xlu0 %v768_v21, %s3416_s25 }
 0x5bb   : > { %v366_v22 = vpop.permute.xlu1 %365 }
 0x5bc   : > { %vm382_vm12 = vcmp.eq.s32.totalorder %v366_v22, %v3507_v15 }
 0x5bd   : > { %v2683_v23 = vsel %vm382_vm12, 1.0, %v3417_v20 }
 0x5be   : > { %2883 = vmatmul.mubr.msk.f32.gmra.mrb[2].mxu0 %vm413_vm2, %v2683_v23 }
 0x5bf   : > { %2921 = vmatprep.mubr.msk.f32.mxu0 %vm3418_vm9, %v3417_v20 }
 0x61f   : > { %v771_v25 = vpop.permute.xlu0 %770 }
 0x620   : > { %774 = vst.msk [vmem:[#allocation4 + $0x8] sm:$0xff] %vm562_vm10, %v771_v25  ;;  %2922 = vmatmul.mubr.msk.f32.vlgmr.msra.gmra.mrb[4].mxu0 %vm562_vm10, %v771_v25 }
 0x621   : > { %3137 = vmatpush3.bf16.msra.mxu0 %v3519_v24  ;;  %2943 = vmatprep.mubr.msk.f32.mxu0 %vm3418_vm9, %v3417_v20 }
 0x622   : > { %3138 = vmatprep.subr.bf16.mxu0 %v3415_v12 }
 0x625   : > { %3140 = vmatpush3.bf16.msra.mxu0 %v3536_v32 }
 0x626   : > { %3147 = vmatprep.subr.bf16.mxu0 %v3415_v12 }
 0x691   : > { %v2884_v15 = vpop.f32.mrb[2].mxu0 }
 0x692   : > { %v518_v26 = vpop.f32.mrb[3].mxu0  ;;  %v524_v51 = vadd.f32 %v2884_v15, %v3569_v40  ;;  %v534_v15 = vadd.f32 %v3560_v36, %v3569_v40 }
 0x693   : > { %v519_v27 = vadd.f32 %v3569_v40, %v518_v26 }
 0x6f3   : > { %v845_v28 = vpop.f32.mrb[4].mxu0 }
 0x6f4   : > { %v849_v29 = vadd.f32 %v845_v28, %v519_v27  ;;  %v2923_v30 = vpop.f32.mrb[5].mxu0 }
 0x6f6   : > { %3261 = vtanh.f32 %v849_v29  ;;  %v2703_v33 = vmul.f32 -1.442695, %v849_v29 }
 0x6f8   : > { %3263 = vpow2.f32 %v2703_v33 }
 0x700   : > { %v3262_v31 = vpop.eup %3261 }
 0x701   : > { %859 = vrot.lane.b32.xlu1 %v3262_v31, %s3419_s17 }
 0x702   : > { %v3264_v34 = vpop.eup %3263 }
 0x703   : > { %v853_v35 = vadd.f32 1.0, %v3264_v34 }
 0x705   : > { %3265 = vrcp.f32 %v853_v35 }
 0x70f   : > { %v3266_v38 = vpop.eup %3265 }
 0x710   : > { %v857_v44 = vmul.f32 %v3266_v38, %v762_v13 }
 0x773   : > { %v860_v41 = vpop.permute.xlu1 %859 }
 0x774   : > { %v862_v43 = vmul.f32 %v3266_v38, %v860_v41  ;;  %v1419_v41 = vld [vmem:[%s3901_s4] sm:$0xff] }
 0x776   : > { %864 = vrot.lane.b32.xlu0 %v862_v43, %s3416_s25  ;;  %v1420_v43 = vld [vmem:[%s3901_s4 + $0x8] sm:$0xff] }
 0x7e8   : > { %v865_v45 = vpop.permute.xlu0 %864 }
 0x7e9   : > { %v867_v46 = vadd.f32 %v865_v45, %v857_v44  ;;  %v3159_v44 = vpack.c.bf16 %v1420_v43, %v1419_v41 }
 0x7eb   : > { %3267 = vtanh.f32 %v867_v46 }
 0x7f5   : > { %v3268_v47 = vpop.eup %3267 }
 0x7f6   : > { %870 = vrot.lane.b32.xlu1 %v3268_v47, %s3419_s17 }
 0x868   : > { %v871_v48 = vpop.permute.xlu1 %870 }
 0x869   : > { %v873_v49 = vmul.f32 %v3266_v38, %v871_v48  ;;  %v1421_v48 = vld [vmem:[%s3901_s4 + $0x10] sm:$0xff] }
 0x86b   : > { %875 = vrot.lane.b32.xlu0 %v873_v49, %s3416_s25  ;;  %v1422_v49 = vld [vmem:[%s3901_s4 + $0x18] sm:$0xff] }
 0x8dd   : > { %v876_v50 = vpop.permute.xlu0 %875 }
 0x8de   : > { %879 = vst.msk [vmem:[#allocation4 + $0x10] sm:$0xff] %vm562_vm10, %v876_v50  ;;  %2933 = vmatmul.mubr.msk.f32.vlgmr.msra.gmra.mrb[8].mxu1 %vm562_vm10, %v876_v50  ;;  %v3163_v50 = vpack.c.bf16 %v1422_v49, %v1421_v48 }
 0x8df   : > { %3143 = vmatpush3.bf16.msra.mxu1 %v3519_v24  ;;  %2954 = vmatprep.mubr.msk.f32.mxu1 %vm3418_vm9, %v3417_v20 }
 0x8e0   : > { %3144 = vmatprep.subr.bf16.mxu1 %v3415_v12 }
 0x8e3   : > { %3146 = vmatpush3.bf16.msra.mxu1 %v3536_v32 }
 0x8e4   : > { %3153 = vmatprep.subr.bf16.mxu1 %v3415_v12 }
 0x9b1   : > { %v950_v52 = vpop.f32.mrb[8].mxu1 }
 0x9b2   : > { %v954_v53 = vadd.f32 %v950_v52, %v524_v51  ;;  %v2934_v54 = vpop.f32.mrb[9].mxu1  ;;  %v1411_v52 = vld [vmem:[#allocation4] sm:$0xff] }
 0x9b3   : > { %v1413_v54 = vld [vmem:[#allocation4 + $0x10] sm:$0xff] }
 0x9b4   : > { %3269 = vtanh.f32 %v954_v53  ;;  %v2705_v56 = vmul.f32 -1.442695, %v954_v53  ;;  %v1412_v53 = vld [vmem:[#allocation4 + $0x8] sm:$0xff] }
 0x9b6   : > { %3271 = vpow2.f32 %v2705_v56 }
 0x9be   : > { %v3270_v55 = vpop.eup %3269 }
 0x9bf   : > { %964 = vrot.lane.b32.xlu1 %v3270_v55, %s3419_s17 }
 0x9c0   : > { %v3272_v57 = vpop.eup %3271 }
 0x9c1   : > { %v958_v58 = vadd.f32 1.0, %v3272_v57 }
 0x9c3   : > { %3273 = vrcp.f32 %v958_v58  ;;  %v539_v58 = vadd.f32 %v3569_v40, %v3571_v42 }
 0x9cd   : > { %v3274_v59 = vpop.eup %3273 }
 0x9ce   : > { %v962_v62 = vmul.f32 %v3274_v59, %v867_v46 }
 0xa31   : > { %v965_v60 = vpop.permute.xlu1 %964 }
 0xa32   : > { %v967_v61 = vmul.f32 %v3274_v59, %v965_v60 }
 0xa34   : > { %969 = vrot.lane.b32.xlu0 %v967_v61, %s3416_s25 }
 0xaa6   : > { %v970_v63 = vpop.permute.xlu0 %969 }
 0xaa7   : > { %v972_v0 = vadd.f32 %v970_v63, %v962_v62 }
 0xaa9   : > { %3275 = vtanh.f32 %v972_v0 }
 0xab3   : > { %v3276_v1 = vpop.eup %3275 }
 0xab4   : > { %975 = vrot.lane.b32.xlu1 %v3276_v1, %s3419_s17 }
 0xb26   : > { %v976_v2 = vpop.permute.xlu1 %975 }
 0xb27   : > { %v978_v3 = vmul.f32 %v3274_v59, %v976_v2 }
 0xb29   : > { %980 = vrot.lane.b32.xlu0 %v978_v3, %s3416_s25 }
 0xb9b   : > { %v981_v4 = vpop.permute.xlu0 %980 }
 0xb9c   : > { %984 = vst.msk [vmem:[#allocation4 + $0x18] sm:$0xff] %vm562_vm10, %v981_v4  ;;  %2944 = vmatmul.mubr.msk.f32.vlgmr.msra.gmra.mrb[6].mxu0 %vm562_vm10, %v981_v4 }
 0xb9d   : > { %3149 = vmatpush3.bf16.msra.mxu0 %v3519_v24  ;;  %2965 = vmatprep.mubr.msk.f32.mxu0 %vm3418_vm9, %v3417_v20 }
 0xb9e   : > { %3150 = vmatprep.subr.bf16.mxu0 %v3415_v12 }
 0xba1   : > { %3152 = vmatpush3.bf16.msra.mxu0 %v3536_v32 }
 0xba2   : > { %3160 = vmatprep.subr.bf16.mxu0 %v3159_v44 }
 0xba3   : > { %v1414_v55 = vld [vmem:[#allocation4 + $0x18] sm:$0xff] }
 0xc6f   : > { %v1055_v6 = vpop.f32.mrb[6].mxu0 }
 0xc70   : > { %v1059_v7 = vadd.f32 %v1055_v6, %v529_v5  ;;  %v2945_v8 = vpop.f32.mrb[7].mxu0 }
 0xc72   : > { %3277 = vtanh.f32 %v1059_v7  ;;  %v2707_v10 = vmul.f32 -1.442695, %v1059_v7 }
 0xc74   : > { %3279 = vpow2.f32 %v2707_v10 }
 0xc7c   : > { %v3278_v9 = vpop.eup %3277 }
 0xc7d   : > { %1069 = vrot.lane.b32.xlu1 %v3278_v9, %s3419_s17 }
 0xc7e   : > { %v3280_v11 = vpop.eup %3279 }
 0xc7f   : > { %v1063_v13 = vadd.f32 1.0, %v3280_v11 }
 0xc81   : > { %3281 = vrcp.f32 %v1063_v13 }
 0xc8b   : > { %v3282_v14 = vpop.eup %3281 }
 0xc8c   : > { %v1067_v18 = vmul.f32 %v3282_v14, %v972_v0 }
 0xcef   : > { %v1070_v16 = vpop.permute.xlu1 %1069 }
 0xcf0   : > { %v1072_v17 = vmul.f32 %v3282_v14, %v1070_v16  ;;  %v1567_v16 = vld [vmem:[%s3902_s5] sm:$0xff] }
 0xcf2   : > { %1074 = vrot.lane.b32.xlu0 %v1072_v17, %s3416_s25  ;;  %v1568_v17 = vld [vmem:[%s3902_s5 + $0x8] sm:$0xff] }
 0xd64   : > { %v1075_v19 = vpop.permute.xlu0 %1074 }
 0xd65   : > { %v1077_v37 = vadd.f32 %v1075_v19, %v1067_v18  ;;  %v3699_v18 = vpack.c.bf16 %v1568_v17, %v1567_v16  ;;  %v1569_v19 = vld [vmem:[%s3902_s5 + $0x10] sm:$0xff] }
 0xd67   : > { %3283 = vtanh.f32 %v1077_v37 }
 0xd71   : > { %v3284_v21 = vpop.eup %3283 }
 0xd72   : > { %1080 = vrot.lane.b32.xlu1 %v3284_v21, %s3419_s17 }
 0xde4   : > { %v1081_v22 = vpop.permute.xlu1 %1080 }
 0xde5   : > { %v1083_v23 = vmul.f32 %v3282_v14, %v1081_v22 }
 0xde7   : > { %1085 = vrot.lane.b32.xlu0 %v1083_v23, %s3416_s25 }
 0xe59   : > { %v1086_v25 = vpop.permute.xlu0 %1085 }
 0xe5a   : > { %1089 = vst.msk [vmem:[#allocation4 + $0x20] sm:$0xff] %vm562_vm10, %v1086_v25  ;;  %2955 = vmatmul.mubr.msk.f32.vlgmr.msra.gmra.mrb[10].mxu1 %vm562_vm10, %v1086_v25  ;;  %v1574_v25 = vld [vmem:[#allocation3 + $0x8] sm:$0xff] }
 0xe5b   : > { %3155 = vmatpush3.bf16.msra.mxu1 %v3519_v24  ;;  %2976 = vmatprep.mubr.msk.f32.mxu1 %vm3418_vm9, %v3417_v20 }
 0xe5c   : > { %3156 = vmatprep.subr.bf16.mxu1 %v3415_v12 }
 0xe5f   : > { %3158 = vmatpush3.bf16.msra.mxu1 %v3536_v32 }
 0xe60   : > { %3167 = vmatprep.subr.bf16.mxu1 %v3415_v12 }
 0xe61   : > { %v1415_v56 = vld [vmem:[#allocation4 + $0x20] sm:$0xff] }
 0xf2d   : > { %v1160_v26 = vpop.f32.mrb[10].mxu1 }
 0xf2e   : > { %v1164_v27 = vadd.f32 %v1160_v26, %v534_v15  ;;  %v2956_v28 = vpop.f32.mrb[11].mxu1  ;;  %v1572_v26 = vld [vmem:[#allocation2 + $0x8] sm:$0xff] }
 0xf2f   : > { %v544_v28 = vadd.f32 %v3564_v39, %v3569_v40 }
 0xf30   : > { %3285 = vtanh.f32 %v1164_v27  ;;  %v2709_v24 = vmul.f32 -1.442695, %v1164_v27 }
 0xf32   : > { %3287 = vpow2.f32 %v2709_v24 }
 0xf3a   : > { %v3286_v29 = vpop.eup %3285 }
 0xf3b   : > { %1174 = vrot.lane.b32.xlu1 %v3286_v29, %s3419_s17 }
 0xf3c   : > { %v3288_v30 = vpop.eup %3287 }
 0xf3d   : > { %v1168_v31 = vadd.f32 1.0, %v3288_v30 }
 0xf3f   : > { %3289 = vrcp.f32 %v1168_v31  ;;  %v3736_v31 = vld [vmem:[%s3903_s6] ss:$0 sm:$0xff] }
 0xf49   : > { %v3290_v33 = vpop.eup %3289 }
 0xf4a   : > { %v1172_v35 = vmul.f32 %v3290_v33, %v1077_v37  ;;  %v1570_v37 = vld [vmem:[%s3902_s5 + $0x18] sm:$0xff] }
 0xf4b   : > { %v3709_v21 = vpack.c.bf16 %v1570_v37, %v1569_v19 }
 0xfad   : > { %v1175_v34 = vpop.permute.xlu1 %1174 }
 0xfae   : > { %v1177_v32 = vmul.f32 %v3290_v33, %v1175_v34 }
 0xfb0   : > { %1179 = vrot.lane.b32.xlu0 %v1177_v32, %s3416_s25 }
0x1022   : > { %v1180_v38 = vpop.permute.xlu0 %1179 }
0x1023   : > { %v1182_v36 = vadd.f32 %v1180_v38, %v1172_v35 }
0x1025   : > { %3291 = vtanh.f32 %v1182_v36 }
0x102f   : > { %v3292_v45 = vpop.eup %3291 }
0x1030   : > { %1185 = vrot.lane.b32.xlu1 %v3292_v45, %s3419_s17 }
0x10a2   : > { %v1186_v46 = vpop.permute.xlu1 %1185 }
0x10a3   : > { %v1188_v47 = vmul.f32 %v3290_v33, %v1186_v46 }
0x10a5   : > { %1190 = vrot.lane.b32.xlu0 %v1188_v47, %s3416_s25 }
0x1117   : > { %v1191_v51 = vpop.permute.xlu0 %1190 }
0x1118   : > { %1194 = vst.msk [vmem:[#allocation4 + $0x28] sm:$0xff] %vm562_vm10, %v1191_v51  ;;  %2966 = vmatmul.mubr.msk.f32.vlgmr.msra.gmra.mrb[8].mxu0 %vm562_vm10, %v1191_v51 }
0x1119   : > { %3162 = vmatpush3.bf16.msra.mxu0 %v3159_v44  ;;  %2987 = vmatprep.mubr.msk.f32.mxu0 %vm562_vm10, %v1411_v52 }
0x111a   : > { %3164 = vmatprep.subr.bf16.mxu0 %v3163_v50 }
0x111d   : > { %3166 = vmatpush3.bf16.msra.mxu0 %v3163_v50 }
0x111e   : > { %3179 = vmatprep.subr.bf16.mxu0 %v3415_v12 }
0x111f   : > { %v1416_v57 = vld [vmem:[#allocation4 + $0x28] sm:$0xff] }
0x1120   : > { %2988 = vmatmul.mubr.msk.f32.vlgmr.msra.gmra.mrb[10].mxu0 %vm562_vm10, %v1412_v53 }
0x1121   : > { %2990 = vmatprep.mubr.msk.f32.mxu0 %vm562_vm10, %v1413_v54  ;;  %3181 = vmatpush3.bf16.msra.mxu0 %v3699_v18 }
0x1122   : > { %3182 = vmatprep.subr.bf16.mxu0 %v3415_v12 }
0x1124   : > { %2991 = vmatmul.mubr.msk.f32.gmra.mrb[12].mxu0 %vm562_vm10, %v1414_v55 }
0x1125   : > { %2993 = vmatprep.mubr.msk.f32.mxu0 %vm562_vm10, %v1415_v56  ;;  %3184 = vmatpush3.bf16.msra.mxu0 %v3709_v21 }
0x1126   : > { %3191 = vmatprep.subr.bf16.mxu0 %v3415_v12 }
0x1128   : > { %2994 = vmatmul.mubr.msk.f32.gmra.mrb[14].mxu0 %vm562_vm10, %v1416_v57 }
0x11eb   : > { %v1265_v59 = vpop.f32.mrb[8].mxu0 }
0x11ec   : > { %v1269_v60 = vadd.f32 %v1265_v59, %v539_v58  ;;  %v2967_v61 = vpop.f32.mrb[9].mxu0 }
0x11ee   : > { %3293 = vtanh.f32 %v1269_v60  ;;  %v2711_v5 = vmul.f32 -1.442695, %v1269_v60 }
0x11f0   : > { %3295 = vpow2.f32 %v2711_v5 }
0x11f3   : > { %v3677_v62 = vpop.f32.mrb[10].mxu0 }
0x11f4   : > { %v1520_v63 = vpop.f32.mrb[11].mxu0 }
0x11f5   : > { %v1521_v33 = vadd.f32 %v3736_v31, %v1520_v63 }
0x11f7   : > { %v3679_v0 = vpop.f32.mrb[12].mxu0 }
0x11f8   : > { %v3294_v1 = vpop.eup %3293  ;;  %v3681_v2 = vpop.f32.mrb[13].mxu0 }
0x11f9   : > { %1279 = vrot.lane.b32.xlu1 %v3294_v1, %s3419_s17 }
0x11fa   : > { %v3296_v42 = vpop.eup %3295 }
0x11fb   : > { %v3684_v3 = vpop.f32.mrb[14].mxu0  ;;  %v1273_v6 = vadd.f32 1.0, %v3296_v42 }
0x11fc   : > { %v3686_v4 = vpop.f32.mrb[15].mxu0 }
0x11fd   : > { %3297 = vrcp.f32 %v1273_v6  ;;  %v1526_v6 = vadd.f32 %v3677_v62, %v3736_v31 }
0x1207   : > { %v3298_v7 = vpop.eup %3297 }
0x1208   : > { %v1277_v10 = vmul.f32 %v3298_v7, %v1182_v36 }
0x126b   : > { %v1280_v8 = vpop.permute.xlu1 %1279 }
0x126c   : > { %v1282_v9 = vmul.f32 %v3298_v7, %v1280_v8 }
0x126e   : > { %1284 = vrot.lane.b32.xlu0 %v1282_v9, %s3416_s25 }
0x12e0   : > { %v1285_v11 = vpop.permute.xlu0 %1284 }
0x12e1   : > { %v3689_v13 = vadd.f32 %v1285_v11, %v1277_v10 }
0x12e3   : > { %3299 = vtanh.f32 %v3689_v13 }
0x12ed   : > { %v3300_v14 = vpop.eup %3299 }
0x12ee   : > { %1290 = vrot.lane.b32.xlu1 %v3300_v14, %s3419_s17 }
0x1360   : > { %v1291_v22 = vpop.permute.xlu1 %1290 }
0x1361   : > { %v1293_v23 = vmul.f32 %v3298_v7, %v1291_v22 }
0x1363   : > { %1295 = vrot.lane.b32.xlu0 %v1293_v23, %s3416_s25 }
0x1367   : > { %1658 = vrot.lane.b32.xlu0 %v1574_v25, %s3416_s25 }
0x13d5   : > { %v1296_v15 = vpop.permute.xlu0 %1295 }
0x13d6   : > { %1299 = vst.msk [vmem:[#allocation4 + $0x30] sm:$0xff] %vm562_vm10, %v1296_v15  ;;  %2977 = vmatmul.mubr.msk.f32.vlgmr.msra.gmra.mrb[12].mxu1 %vm562_vm10, %v1296_v15 }
0x13d7   : > { %3169 = vmatpush3.bf16.msra.mxu1 %v3699_v18  ;;  %3007 = vmatprep.mubr.msk.f32.mxu1 %vm3418_vm9, %v3417_v20 }
0x13d8   : > { %3170 = vmatprep.subr.bf16.mxu1 %v3415_v12 }
0x13d9   : > { %v1659_v45 = vpop.permute.xlu0 %1658 }
0x13db   : > { %3172 = vmatpush3.bf16.msra.mxu1 %v3709_v21 }
0x13dc   : > { %3173 = vmatprep.subr.bf16.mxu1 %v3415_v12 }
0x13dd   : > { %v1417_v27 = vld [vmem:[#allocation4 + $0x30] sm:$0xff] }
0x13de   : > { %3008 = vmatmul.mubr.msk.f32.vlgmr.msra.gmra.mrb[14].mxu1 %vm562_vm10, %v1572_v26  ;;  %2996 = vmatprep.mubr.msk.f32.mxu0 %vm562_vm10, %v1417_v27 }
0x13df   : > { %3175 = vmatpush3.bf16.msra.mxu1 %v3699_v18  ;;  %3018 = vmatprep.mubr.msk.f32.mxu1 %vm3418_vm9, %v3417_v20 }
0x13e0   : > { %3176 = vmatprep.subr.bf16.mxu1 %v3415_v12 }
0x13e3   : > { %3178 = vmatpush3.bf16.msra.mxu1 %v3709_v21 }
0x13e4   : > { %3185 = vmatprep.subr.bf16.mxu1 %v3415_v12 }
0x14a9   : > { %v1370_v29 = vpop.f32.mrb[12].mxu1 }
0x14aa   : > { %v1374_v24 = vadd.f32 %v1370_v29, %v544_v28  ;;  %v2978_v30 = vpop.f32.mrb[13].mxu1 }
0x14ab   : > { %v1531_v30 = vadd.f32 %v3736_v31, %v3681_v2 }
0x14ac   : > { %v2713_v51 = vmul.f32 -1.442695, %v1374_v24 }
0x14b1   : > { %v1645_v34 = vpop.f32.mrb[14].mxu1 }
0x14b2   : > { %v1649_v32 = vadd.f32 %v1645_v34, %v1521_v33  ;;  %v3009_v35 = vpop.f32.mrb[15].mxu1 }
0x14b4   : > { %3301 = vtanh.f32 %v1649_v32  ;;  %v2724_v36 = vmul.f32 -1.442695, %v1649_v32 }
0x14b6   : > { %3303 = vpow2.f32 %v2724_v36 }
0x14be   : > { %v3302_v38 = vpop.eup %3301 }
0x14bf   : > { %1663 = vrot.lane.b32.xlu1 %v3302_v38, %s3419_s17 }
0x14c0   : > { %v3304_v39 = vpop.eup %3303 }
0x14c1   : > { %v1653_v40 = vadd.f32 1.0, %v3304_v39 }
0x14c3   : > { %3305 = vrcp.f32 %v1653_v40 }
0x14cd   : > { %v3306_v41 = vpop.eup %3305 }
0x14ce   : > { %v1661_v46 = vmul.f32 %v3306_v41, %v1659_v45 }
0x1531   : > { %v1664_v43 = vpop.permute.xlu1 %1663 }
0x1532   : > { %v1666_v44 = vmul.f32 %v3306_v41, %v1664_v43 }
0x1534   : > { %1668 = vrot.lane.b32.xlu1 %v1666_v44, %s3416_s25 }
0x15a6   : > { %v1669_v47 = vpop.permute.xlu1 %1668 }
0x15a7   : > { %v1671_v48 = vadd.f32 %v1669_v47, %v1661_v46 }
0x15a9   : > { %3307 = vtanh.f32 %v1671_v48 }
0x15aa   : > { %3309 = vtanh.f32 %v1374_v24 }
0x15ab   : > { %3311 = vpow2.f32 %v2713_v51 }
0x15b3   : > { %v3308_v49 = vpop.eup %3307 }
0x15b4   : > { %1674 = vrot.lane.b32.xlu0 %v3308_v49, %s3419_s17  ;;  %v3310_v50 = vpop.eup %3309 }
0x15b5   : > { %v3312_v52 = vpop.eup %3311 }
0x15b6   : > { %v1378_v53 = vadd.f32 1.0, %v3312_v52 }
0x15b8   : > { %1384 = vrot.lane.b32.xlu0 %v3310_v50, %s3419_s17  ;;  %3313 = vrcp.f32 %v1378_v53  ;;  %v1536_v50 = vadd.f32 %v3679_v0, %v3736_v31 }
0x15c2   : > { %v3314_v56 = vpop.eup %3313 }
0x15c3   : > { %v1382_v60 = vmul.f32 %v3314_v56, %v3689_v13 }
0x1626   : > { %v1675_v54 = vpop.permute.xlu0 %1674 }
0x1627   : > { %v1677_v55 = vmul.f32 %v3306_v41, %v1675_v54 }
0x1629   : > { %1679 = vrot.lane.b32.xlu1 %v1677_v55, %s3416_s25 }
0x162a   : > { %v1385_v57 = vpop.permute.xlu0 %1384 }
0x162b   : > { %v1387_v58 = vmul.f32 %v3314_v56, %v1385_v57 }
0x162d   : > { %1389 = vrot.lane.b32.xlu0 %v1387_v58, %s3416_s25 }
0x169b   : > { %v1680_v59 = vpop.permute.xlu1 %1679 }
0x169c   : > { %1682 = vst.msk [vmem:[#allocation4] sm:$0xff] %vm562_vm10, %v1680_v59  ;;  %3019 = vmatmul.mubr.msk.f32.vlgmr.msra.gmra.mrb[16].mxu1 %vm562_vm10, %v1680_v59 }
0x169d   : > { %3187 = vmatpush3.bf16.msra.mxu1 %v3699_v18  ;;  %3040 = vmatprep.mubr.msk.f32.mxu1 %vm3418_vm9, %v3417_v20 }
0x169e   : > { %3188 = vmatprep.subr.bf16.mxu1 %v3415_v12 }
0x169f   : > { %v1390_v61 = vpop.permute.xlu0 %1389 }
0x16a0   : > { %v3752_v63 = vadd.f32 %v1390_v61, %v1382_v60 }
0x16a1   : > { %3190 = vmatpush3.bf16.msra.mxu1 %v3709_v21 }
0x16a2   : > { %3315 = vtanh.f32 %v3752_v63  ;;  %3197 = vmatprep.subr.bf16.mxu1 %v3415_v12 }
0x16ac   : > { %v3316_v1 = vpop.eup %3315 }
0x16ad   : > { %1395 = vrot.lane.b32.xlu0 %v3316_v1, %s3419_s17 }
0x171f   : > { %v1396_v5 = vpop.permute.xlu0 %1395 }
0x1720   : > { %v1398_v42 = vmul.f32 %v3314_v56, %v1396_v5 }
0x1722   : > { %1400 = vrot.lane.b32.xlu0 %v1398_v42, %s3416_s25 }
0x176f   : > { %v1752_v7 = vpop.f32.mrb[16].mxu1 }
0x1770   : > { %v1756_v8 = vadd.f32 %v1752_v7, %v1526_v6  ;;  %v3020_v9 = vpop.f32.mrb[17].mxu1 }
0x1772   : > { %3317 = vtanh.f32 %v1756_v8  ;;  %v2726_v14 = vmul.f32 -1.442695, %v1756_v8  ;;  %v1541_v8 = vadd.f32 %v3736_v31, %v3686_v4 }
0x1774   : > { %3319 = vpow2.f32 %v2726_v14 }
0x177c   : > { %v3318_v10 = vpop.eup %3317 }
0x177d   : > { %1766 = vrot.lane.b32.xlu1 %v3318_v10, %s3419_s17 }
0x177e   : > { %v3320_v62 = vpop.eup %3319 }
0x177f   : > { %v1760_v16 = vadd.f32 1.0, %v3320_v62 }
0x1781   : > { %3321 = vrcp.f32 %v1760_v16 }
0x178b   : > { %v3322_v17 = vpop.eup %3321 }
0x178c   : > { %v1764_v22 = vmul.f32 %v3322_v17, %v1671_v48 }
0x1794   : > { %v1401_v11 = vpop.permute.xlu0 %1400 }
0x1795   : > { %1404 = vst.msk [vmem:[#allocation4 + $0x38] sm:$0xff] %vm562_vm10, %v1401_v11  ;;  %1405 = vst.msk [vmem:[#allocation2] sm:$0xff] %vm562_vm10, %v1401_v11 }
0x179c   : > { %v1418_v13 = vld [vmem:[#allocation4 + $0x38] sm:$0xff] }
0x179d   : > { %2997 = vmatmul.mubr.msk.f32.gmra.mrb[16].mxu0 %vm562_vm10, %v1418_v13 }
0x179e   : > { %3029 = vmatprep.mubr.msk.f32.mxu0 %vm3418_vm9, %v3417_v20 }
0x17ef   : > { %v1767_v19 = vpop.permute.xlu1 %1766 }
0x17f0   : > { %v1769_v37 = vmul.f32 %v3322_v17, %v1767_v19 }
0x17f2   : > { %1771 = vrot.lane.b32.xlu1 %v1769_v37, %s3416_s25 }
0x1864   : > { %v1772_v23 = vpop.permute.xlu1 %1771 }
0x1865   : > { %v1774_v25 = vadd.f32 %v1772_v23, %v1764_v22 }
0x1867   : > { %3323 = vtanh.f32 %v1774_v25 }
0x1870   : > { %v3768_v15 = vpop.f32.mrb[16].mxu0 }
0x1871   : > { %v3324_v26 = vpop.eup %3323  ;;  %v3770_v27 = vpop.f32.mrb[17].mxu0 }
0x1872   : > { %1777 = vrot.lane.b32.xlu1 %v3324_v26, %s3419_s17 }
0x18e4   : > { %v1778_v28 = vpop.permute.xlu1 %1777 }
0x18e5   : > { %v1780_v29 = vmul.f32 %v3322_v17, %v1778_v28 }
0x18e7   : > { %1782 = vrot.lane.b32.xlu1 %v1780_v29, %s3416_s25 }
0x1959   : > { %v1783_v24 = vpop.permute.xlu1 %1782 }
0x195a   : > { %1785 = vst.msk [vmem:[#allocation4 + $0x8] sm:$0xff] %vm562_vm10, %v1783_v24  ;;  %3030 = vmatmul.mubr.msk.f32.vlgmr.msra.gmra.mrb[18].mxu0 %vm562_vm10, %v1783_v24  ;;  %v1546_v24 = vadd.f32 %v3684_v3, %v3736_v31 }
0x195b   : > { %3193 = vmatpush3.bf16.msra.mxu0 %v3699_v18  ;;  %3051 = vmatprep.mubr.msk.f32.mxu0 %vm3418_vm9, %v3417_v20 }
0x195c   : > { %3194 = vmatprep.subr.bf16.mxu0 %v3415_v12 }
0x195f   : > { %3196 = vmatpush3.bf16.msra.mxu0 %v3709_v21 }
0x1960   : > { %3203 = vmatprep.subr.bf16.mxu0 %v3415_v12 }
0x1a2d   : > { %v1855_v33 = vpop.f32.mrb[18].mxu0 }
0x1a2e   : > { %v1859_v34 = vadd.f32 %v1855_v33, %v1531_v30  ;;  %v3031_v32 = vpop.f32.mrb[19].mxu0 }
0x1a30   : > { %3325 = vtanh.f32 %v1859_v34  ;;  %v2728_v38 = vmul.f32 -1.442695, %v1859_v34 }
0x1a32   : > { %3327 = vpow2.f32 %v2728_v38 }
0x1a3a   : > { %v3326_v35 = vpop.eup %3325 }
0x1a3b   : > { %1869 = vrot.lane.b32.xlu0 %v3326_v35, %s3419_s17 }
0x1a3c   : > { %v3328_v36 = vpop.eup %3327 }
0x1a3d   : > { %v1863_v39 = vadd.f32 1.0, %v3328_v36 }
0x1a3f   : > { %3329 = vrcp.f32 %v1863_v39 }
0x1a49   : > { %v3330_v40 = vpop.eup %3329 }
0x1a4a   : > { %v1867_v44 = vmul.f32 %v3330_v40, %v1774_v25 }
0x1aad   : > { %v1870_v41 = vpop.permute.xlu0 %1869 }
0x1aae   : > { %v1872_v43 = vmul.f32 %v3330_v40, %v1870_v41  ;;  %v2419_v41 = vld [vmem:[%s3904_s7 + $0x8] sm:$0xff] }
0x1ab0   : > { %1874 = vrot.lane.b32.xlu1 %v1872_v43, %s3416_s25 }
0x1b22   : > { %v1875_v45 = vpop.permute.xlu1 %1874 }
0x1b23   : > { %v1877_v2 = vadd.f32 %v1875_v45, %v1867_v44 }
0x1b25   : > { %3331 = vtanh.f32 %v1877_v2 }
0x1b2f   : > { %v3332_v46 = vpop.eup %3331 }
0x1b30   : > { %1880 = vrot.lane.b32.xlu0 %v3332_v46, %s3419_s17  ;;  %v2420_v46 = vld [vmem:[%s3904_s7 + $0x10] sm:$0xff] }
0x1ba2   : > { %v1881_v47 = vpop.permute.xlu0 %1880 }
0x1ba3   : > { %v1883_v48 = vmul.f32 %v3330_v40, %v1881_v47  ;;  %v2418_v40 = vld [vmem:[%s3904_s7] sm:$0xff]  ;;  %v2421_v47 = vld [vmem:[%s3904_s7 + $0x18] sm:$0xff] }
0x1ba4   : > { %v3215_v43 = vpack.c.bf16 %v2419_v41, %v2418_v40 }
0x1ba5   : > { %1885 = vrot.lane.b32.xlu1 %v1883_v48, %s3416_s25  ;;  %v3219_v48 = vpack.c.bf16 %v2421_v47, %v2420_v46 }
0x1c17   : > { %v1886_v49 = vpop.permute.xlu1 %1885 }
0x1c18   : > { %1888 = vst.msk [vmem:[#allocation4 + $0x10] sm:$0xff] %vm562_vm10, %v1886_v49  ;;  %3041 = vmatmul.mubr.msk.f32.vlgmr.msra.gmra.mrb[18].mxu1 %vm562_vm10, %v1886_v49 }
0x1c19   : > { %3199 = vmatpush3.bf16.msra.mxu1 %v3699_v18  ;;  %3062 = vmatprep.mubr.msk.f32.mxu1 %vm3418_vm9, %v3417_v20 }
0x1c1a   : > { %3200 = vmatprep.subr.bf16.mxu1 %v3415_v12 }
0x1c1d   : > { %3202 = vmatpush3.bf16.msra.mxu1 %v3709_v21 }
0x1c1e   : > { %3209 = vmatprep.subr.bf16.mxu1 %v3415_v12 }
0x1ceb   : > { %v1958_v51 = vpop.f32.mrb[18].mxu1 }
0x1cec   : > { %v1962_v52 = vadd.f32 %v1958_v51, %v1536_v50  ;;  %v3042_v53 = vpop.f32.mrb[19].mxu1  ;;  %v2410_v50 = vld [vmem:[#allocation4] sm:$0xff]  ;;  %v2411_v51 = vld [vmem:[#allocation4 + $0x8] sm:$0xff] }
0x1cee   : > { %3333 = vtanh.f32 %v1962_v52  ;;  %v2730_v55 = vmul.f32 -1.442695, %v1962_v52  ;;  %v2412_v52 = vld [vmem:[#allocation4 + $0x10] sm:$0xff] }
0x1cf0   : > { %3335 = vpow2.f32 %v2730_v55 }
0x1cf8   : > { %v3334_v54 = vpop.eup %3333 }
0x1cf9   : > { %1972 = vrot.lane.b32.xlu0 %v3334_v54, %s3419_s17 }
0x1cfa   : > { %v3336_v56 = vpop.eup %3335 }
0x1cfb   : > { %v1966_v57 = vadd.f32 1.0, %v3336_v56  ;;  %v1551_v56 = vadd.f32 %v3736_v31, %v3770_v27 }
0x1cfd   : > { %3337 = vrcp.f32 %v1966_v57 }
0x1d07   : > { %v3338_v58 = vpop.eup %3337 }
0x1d08   : > { %v1970_v61 = vmul.f32 %v3338_v58, %v1877_v2 }
0x1d6b   : > { %v1973_v59 = vpop.permute.xlu0 %1972 }
0x1d6c   : > { %v1975_v60 = vmul.f32 %v3338_v58, %v1973_v59 }
0x1d6e   : > { %1977 = vrot.lane.b32.xlu1 %v1975_v60, %s3416_s25  ;;  %v3856_v60 = vld [vmem:[%s3905_s8] ss:$0 sm:$0xff] }
0x1de0   : > { %v1978_v1 = vpop.permute.xlu1 %1977 }
0x1de1   : > { %v1980_v0 = vadd.f32 %v1978_v1, %v1970_v61 }
0x1de3   : > { %3339 = vtanh.f32 %v1980_v0 }
0x1ded   : > { %v3340_v5 = vpop.eup %3339 }
0x1dee   : > { %1983 = vrot.lane.b32.xlu0 %v3340_v5, %s3419_s17 }
0x1e60   : > { %v1984_v42 = vpop.permute.xlu0 %1983 }
0x1e61   : > { %v1986_v6 = vmul.f32 %v3338_v58, %v1984_v42 }
0x1e63   : > { %1988 = vrot.lane.b32.xlu1 %v1986_v6, %s3416_s25 }
0x1ed5   : > { %v1989_v7 = vpop.permute.xlu1 %1988 }
0x1ed6   : > { %1991 = vst.msk [vmem:[#allocation4 + $0x18] sm:$0xff] %vm562_vm10, %v1989_v7  ;;  %3052 = vmatmul.mubr.msk.f32.vlgmr.msra.gmra.mrb[20].mxu0 %vm562_vm10, %v1989_v7 }
0x1ed7   : > { %3205 = vmatpush3.bf16.msra.mxu0 %v3699_v18  ;;  %3073 = vmatprep.mubr.msk.f32.mxu0 %vm3418_vm9, %v3417_v20 }
0x1ed8   : > { %3206 = vmatprep.subr.bf16.mxu0 %v3415_v12 }
0x1edb   : > { %3208 = vmatpush3.bf16.msra.mxu0 %v3709_v21 }
0x1edc   : > { %3216 = vmatprep.subr.bf16.mxu0 %v3215_v43 }
0x1edd   : > { %v2413_v53 = vld [vmem:[#allocation4 + $0x18] sm:$0xff] }
0x1fa9   : > { %v2061_v9 = vpop.f32.mrb[20].mxu0 }
0x1faa   : > { %v2065_v10 = vadd.f32 %v2061_v9, %v1541_v8  ;;  %v3053_v11 = vpop.f32.mrb[21].mxu0 }
0x1fac   : > { %3341 = vtanh.f32 %v2065_v10  ;;  %v2732_v14 = vmul.f32 -1.442695, %v2065_v10 }
0x1fae   : > { %3343 = vpow2.f32 %v2732_v14 }
0x1fb6   : > { %v3342_v13 = vpop.eup %3341 }
0x1fb7   : > { %2075 = vrot.lane.b32.xlu0 %v3342_v13, %s3419_s17 }
0x1fb8   : > { %v3344_v62 = vpop.eup %3343 }
0x1fb9   : > { %v2069_v16 = vadd.f32 1.0, %v3344_v62 }
0x1fbb   : > { %3345 = vrcp.f32 %v2069_v16 }
0x1fc5   : > { %v3346_v17 = vpop.eup %3345 }
0x1fc6   : > { %v2073_v22 = vmul.f32 %v3346_v17, %v1980_v0 }
0x2029   : > { %v2076_v19 = vpop.permute.xlu0 %2075 }
0x202a   : > { %v2078_v37 = vmul.f32 %v3346_v17, %v2076_v19 }
0x202c   : > { %2080 = vrot.lane.b32.xlu1 %v2078_v37, %s3416_s25 }
0x209e   : > { %v2081_v23 = vpop.permute.xlu1 %2080 }
0x209f   : > { %v2083_v4 = vadd.f32 %v2081_v23, %v2073_v22 }
0x20a1   : > { %3347 = vtanh.f32 %v2083_v4 }
0x20ab   : > { %v3348_v25 = vpop.eup %3347 }
0x20ac   : > { %2086 = vrot.lane.b32.xlu0 %v3348_v25, %s3419_s17 }
0x211e   : > { %v2087_v26 = vpop.permute.xlu0 %2086 }
0x211f   : > { %v2089_v28 = vmul.f32 %v3346_v17, %v2087_v26 }
0x2121   : > { %2091 = vrot.lane.b32.xlu1 %v2089_v28, %s3416_s25 }
0x2193   : > { %v2092_v29 = vpop.permute.xlu1 %2091 }
0x2194   : > { %2094 = vst.msk [vmem:[#allocation4 + $0x20] sm:$0xff] %vm562_vm10, %v2092_v29  ;;  %3063 = vmatmul.mubr.msk.f32.vlgmr.msra.gmra.mrb[20].mxu1 %vm562_vm10, %v2092_v29 }
0x2195   : > { %3211 = vmatpush3.bf16.msra.mxu1 %v3699_v18  ;;  %3084 = vmatprep.mubr.msk.f32.mxu1 %vm3418_vm9, %v3417_v20 }
0x2196   : > { %3212 = vmatprep.subr.bf16.mxu1 %v3415_v12 }
0x2199   : > { %3214 = vmatpush3.bf16.msra.mxu1 %v3709_v21 }
0x219b   : > { %v2414_v54 = vld [vmem:[#allocation4 + $0x20] sm:$0xff] }
0x2267   : > { %v2164_v30 = vpop.f32.mrb[20].mxu1 }
0x2268   : > { %v2168_v33 = vadd.f32 %v2164_v30, %v1546_v24  ;;  %v3064_v34 = vpop.f32.mrb[21].mxu1 }
0x226a   : > { %3349 = vtanh.f32 %v2168_v33  ;;  %v2734_v35 = vmul.f32 -1.442695, %v2168_v33 }
0x226c   : > { %3351 = vpow2.f32 %v2734_v35 }
0x2274   : > { %v3350_v32 = vpop.eup %3349 }
0x2275   : > { %2178 = vrot.lane.b32.xlu0 %v3350_v32, %s3419_s17 }
0x2276   : > { %v3352_v18 = vpop.eup %3351 }
0x2277   : > { %v2172_v38 = vadd.f32 1.0, %v3352_v18 }
0x2279   : > { %3353 = vrcp.f32 %v2172_v38 }
0x2283   : > { %v3354_v20 = vpop.eup %3353 }
0x2284   : > { %v2176_v21 = vmul.f32 %v3354_v20, %v2083_v4 }
0x22e7   : > { %v2179_v36 = vpop.permute.xlu0 %2178 }
0x22e8   : > { %v2181_v12 = vmul.f32 %v3354_v20, %v2179_v36 }
0x22ea   : > { %2183 = vrot.lane.b32.xlu1 %v2181_v12, %s3416_s25 }
0x235c   : > { %v2184_v39 = vpop.permute.xlu1 %2183 }
0x235d   : > { %v3826_v3 = vadd.f32 %v2184_v39, %v2176_v21 }
0x235f   : > { %3355 = vtanh.f32 %v3826_v3 }
0x2369   : > { %v3356_v44 = vpop.eup %3355 }
0x236a   : > { %2189 = vrot.lane.b32.xlu0 %v3356_v44, %s3419_s17 }
0x23dc   : > { %v2190_v45 = vpop.permute.xlu0 %2189 }
0x23dd   : > { %v2192_v2 = vmul.f32 %v3354_v20, %v2190_v45 }
0x23df   : > { %2194 = vrot.lane.b32.xlu1 %v2192_v2, %s3416_s25 }
0x2451   : > { %v2195_v49 = vpop.permute.xlu1 %2194 }
0x2452   : > { %2197 = vst.msk [vmem:[#allocation4 + $0x28] sm:$0xff] %vm562_vm10, %v2195_v49  ;;  %3074 = vmatmul.mubr.msk.f32.vlgmr.msra.gmra.mrb[22].mxu0 %vm562_vm10, %v2195_v49 }
0x2453   : > { %3218 = vmatpush3.bf16.msra.mxu0 %v3215_v43  ;;  %3095 = vmatprep.mubr.msk.f32.mxu0 %vm562_vm10, %v2410_v50 }
0x2454   : > { %3220 = vmatprep.subr.bf16.mxu0 %v3219_v48 }
0x2457   : > { %3222 = vmatpush3.bf16.msra.mxu0 %v3219_v48 }
0x2459   : > { %v2415_v55 = vld [vmem:[#allocation4 + $0x28] sm:$0xff] }
0x245a   : > { %3096 = vmatmul.mubr.msk.f32.vlgmr.msra.gmra.mrb[24].mxu0 %vm562_vm10, %v2411_v51 }
0x245b   : > { %3098 = vmatprep.mubr.msk.f32.mxu0 %vm562_vm10, %v2412_v52 }
0x245e   : > { %3099 = vmatmul.mubr.msk.f32.gmra.mrb[26].mxu0 %vm562_vm10, %v2413_v53 }
0x245f   : > { %3101 = vmatprep.mubr.msk.f32.mxu0 %vm562_vm10, %v2414_v54 }
0x2462   : > { %3102 = vmatmul.mubr.msk.f32.gmra.mrb[28].mxu0 %vm562_vm10, %v2415_v55 }
0x2525   : > { %v2267_v57 = vpop.f32.mrb[22].mxu0 }
0x2526   : > { %v2271_v58 = vadd.f32 %v2267_v57, %v1551_v56  ;;  %v3075_v59 = vpop.f32.mrb[23].mxu0 }
0x2528   : > { %3357 = vtanh.f32 %v2271_v58  ;;  %v2736_v21 = vmul.f32 -1.442695, %v2271_v58 }
0x252d   : > { %v3097_v61 = vpop.f32.mrb[24].mxu0 }
0x252e   : > { %v2525_v1 = vadd.f32 %v3097_v61, %v3856_v60  ;;  %v2519_v0 = vpop.f32.mrb[25].mxu0 }
0x252f   : > { %v2520_v5 = vadd.f32 %v3856_v60, %v2519_v0 }
0x2530   : > { %v2749_v42 = vmul.f32 -1.442695, %v2525_v1 }
0x2531   : > { %v2748_v6 = vmul.f32 -1.442695, %v2520_v5  ;;  %v3100_v7 = vpop.f32.mrb[26].mxu0 }
0x2532   : > { %v3358_v8 = vpop.eup %3357  ;;  %3359 = vpow2.f32 %v2749_v42  ;;  %v2535_v27 = vadd.f32 %v3100_v7, %v3856_v60  ;;  %v2529_v9 = vpop.f32.mrb[27].mxu0 }
0x2533   : > { %3361 = vpow2.f32 %v2748_v6  ;;  %v2530_v10 = vadd.f32 %v3856_v60, %v2529_v9  ;;  %2281 = vrot.lane.b32.xlu0 %v3358_v8, %s3419_s17 }
0x2534   : > { %v2751_v11 = vmul.f32 -1.442695, %v2535_v27 }
0x2535   : > { %v2750_v13 = vmul.f32 -1.442695, %v2530_v10  ;;  %v3103_v14 = vpop.f32.mrb[28].mxu0 }
0x2536   : > { %3363 = vpow2.f32 %v2751_v11  ;;  %v2545_v62 = vadd.f32 %v3103_v14, %v3856_v60  ;;  %v2539_v16 = vpop.f32.mrb[29].mxu0 }
0x2537   : > { %v2540_v17 = vadd.f32 %v3856_v60, %v2539_v16  ;;  %3365 = vpow2.f32 %v2750_v13 }
0x2538   : > { %v2753_v19 = vmul.f32 -1.442695, %v2545_v62 }
0x2539   : > { %v2752_v37 = vmul.f32 -1.442695, %v2540_v17 }
0x253a   : > { %3367 = vpow2.f32 %v2753_v19 }
0x253b   : > { %3369 = vpow2.f32 %v2752_v37 }
0x253c   : > { %v3360_v22 = vpop.eup %3359 }
0x253d   : > { %v3362_v23 = vpop.eup %3361  ;;  %v2583_v4 = vadd.f32 1.0, %v3360_v22 }
0x253e   : > { %v2582_v25 = vadd.f32 1.0, %v3362_v23 }
0x253f   : > { %3371 = vrcp.f32 %v2583_v4 }
0x2540   : > { %v3364_v26 = vpop.eup %3363  ;;  %3373 = vrcp.f32 %v2582_v25 }
0x2541   : > { %v2585_v28 = vadd.f32 1.0, %v3364_v26  ;;  %v3366_v29 = vpop.eup %3365 }
0x2542   : > { %v2584_v24 = vadd.f32 1.0, %v3366_v29 }
0x2543   : > { %3375 = vrcp.f32 %v2585_v28 }
0x2544   : > { %v3368_v30 = vpop.eup %3367  ;;  %3377 = vrcp.f32 %v2584_v24 }
0x2545   : > { %v3370_v33 = vpop.eup %3369  ;;  %v2587_v34 = vadd.f32 1.0, %v3368_v30 }
0x2546   : > { %v2586_v32 = vadd.f32 1.0, %v3370_v33 }
0x2547   : > { %3379 = vrcp.f32 %v2587_v34 }
0x2548   : > { %3381 = vrcp.f32 %v2586_v32 }
0x2549   : > { %v3372_v35 = vpop.eup %3371  ;;  %3383 = vpow2.f32 %v2736_v21 }
0x254a   : > { %v3374_v18 = vpop.eup %3373  ;;  %2607 = vst [vmem:[%s3487_s18 + $0x8] sm:$0xff] %v3372_v35 }
0x254b   : > { %2606 = vst [vmem:[%s3487_s18] sm:$0xff] %v3374_v18 }
0x254d   : > { %v3376_v38 = vpop.eup %3375 }
0x254e   : > { %2609 = vst [vmem:[%s3487_s18 + $0x18] sm:$0xff] %v3376_v38  ;;  %v3378_v20 = vpop.eup %3377 }
0x254f   : > { %2608 = vst [vmem:[%s3487_s18 + $0x10] sm:$0xff] %v3378_v20 }
0x2551   : > { %v3380_v36 = vpop.eup %3379 }
0x2552   : > { %v3382_v12 = vpop.eup %3381  ;;  %2611 = vst [vmem:[%s3487_s18 + $0x28] sm:$0xff] %v3380_v36 }
0x2553   : > { %2610 = vst [vmem:[%s3487_s18 + $0x20] sm:$0xff] %v3382_v12  ;;  %v3384_v39 = vpop.eup %3383 }
0x2554   : > { %v2275_v40 = vadd.f32 1.0, %v3384_v39 }
0x2556   : > { %3385 = vrcp.f32 %v2275_v40 }
0x2560   : > { %v3386_v41 = vpop.eup %3385 }
0x2561   : > { %v2279_v45 = vmul.f32 %v3386_v41, %v3826_v3  ;;  %v1556_v3 = vadd.f32 %v3768_v15, %v3736_v31 }
0x25a5   : > { %v2282_v43 = vpop.permute.xlu0 %2281 }
0x25a6   : > { %v2284_v44 = vmul.f32 %v3386_v41, %v2282_v43 }
0x25a8   : > { %2286 = vrot.lane.b32.xlu1 %v2284_v44, %s3416_s25 }
0x261a   : > { %v2287_v2 = vpop.permute.xlu1 %2286 }
0x261b   : > { %v2289_v46 = vadd.f32 %v2287_v2, %v2279_v45 }
0x261d   : > { %3387 = vtanh.f32 %v2289_v46 }
0x2627   : > { %v3388_v47 = vpop.eup %3387 }
0x2628   : > { %2292 = vrot.lane.b32.xlu0 %v3388_v47, %s3419_s17 }
0x269a   : > { %v2293_v48 = vpop.permute.xlu0 %2292 }
0x269b   : > { %v2295_v49 = vmul.f32 %v3386_v41, %v2293_v48 }
0x269d   : > { %2297 = vrot.lane.b32.xlu1 %v2295_v49, %s3416_s25 }
0x270f   : > { %v2298_v50 = vpop.permute.xlu1 %2297 }
0x2710   : > { %2300 = vst.msk [vmem:[#allocation4 + $0x30] sm:$0xff] %vm562_vm10, %v2298_v50  ;;  %3085 = vmatmul.mubr.msk.f32.vlgmr.msra.gmra.mrb[22].mxu1 %vm562_vm10, %v2298_v50 }
0x2717   : > { %v2416_v51 = vld [vmem:[#allocation4 + $0x30] sm:$0xff] }
0x2718   : > { %3104 = vmatprep.mubr.msk.f32.mxu0 %vm562_vm10, %v2416_v51 }
0x27e3   : > { %v2370_v52 = vpop.f32.mrb[22].mxu1 }
0x27e4   : > { %v2374_v53 = vadd.f32 %v2370_v52, %v1556_v3  ;;  %v3086_v54 = vpop.f32.mrb[23].mxu1 }
0x27e6   : > { %3389 = vtanh.f32 %v2374_v53  ;;  %v2738_v56 = vmul.f32 -1.442695, %v2374_v53 }
0x27e8   : > { %3391 = vpow2.f32 %v2738_v56 }
0x27f0   : > { %v3390_v55 = vpop.eup %3389 }
0x27f1   : > { %2384 = vrot.lane.b32.xlu0 %v3390_v55, %s3419_s17 }
0x27f2   : > { %v3392_v57 = vpop.eup %3391 }
0x27f3   : > { %v2378_v58 = vadd.f32 1.0, %v3392_v57 }
0x27f5   : > { %3393 = vrcp.f32 %v2378_v58 }
0x27ff   : > { %v3394_v59 = vpop.eup %3393 }
0x2800   : > { %v2382_v0 = vmul.f32 %v3394_v59, %v2289_v46 }
0x2863   : > { %v2385_v61 = vpop.permute.xlu0 %2384 }
0x2864   : > { %v2387_v1 = vmul.f32 %v3394_v59, %v2385_v61 }
0x2866   : > { %2389 = vrot.lane.b32.xlu1 %v2387_v1, %s3416_s25 }
0x28d8   : > { %v2390_v5 = vpop.permute.xlu1 %2389 }
0x28d9   : > { %v2392_v31 = vadd.f32 %v2390_v5, %v2382_v0 }
0x28db   : > { %3395 = vtanh.f32 %v2392_v31 }
0x28e5   : > { %v3396_v15 = vpop.eup %3395 }
0x28e6   : > { %2395 = vrot.lane.b32.xlu0 %v3396_v15, %s3419_s17 }
0x28ea   : > { %1407 = vrot.lane.b32.xlu0 %v3752_v63, %s3420_s10 }
0x2958   : > { %v2396_v42 = vpop.permute.xlu0 %2395 }
0x2959   : > { %v2398_v6 = vmul.f32 %v3394_v59, %v2396_v42 }
0x295b   : > { %2400 = vrot.lane.b32.xlu1 %v2398_v6, %s3416_s25 }
0x295c   : > { %v1408_v7 = vpop.permute.xlu0 %1407 }
0x295d   : > { %1410 = vst.msk [vmem:[#allocation3] sm:$0xff] %vm562_vm10, %v1408_v7 }
0x295f   : > { %2406 = vrot.lane.b32.xlu1 %v2392_v31, %s3420_s10 }
0x29cd   : > { %v2401_v8 = vpop.permute.xlu1 %2400 }
0x29ce   : > { %2403 = vst.msk [vmem:[#allocation4 + $0x38] sm:$0xff] %vm562_vm10, %v2401_v8  ;;  %2404 = vst.msk [vmem:[#allocation2 + $0x8] sm:$0xff] %vm562_vm10, %v2401_v8 }
0x29d1   : > { %v2407_v27 = vpop.permute.xlu1 %2406 }
0x29d2   : > { %2409 = vst.msk [vmem:[#allocation3 + $0x8] sm:$0xff] %vm562_vm10, %v2407_v27 }
0x29d5   : > { %v2417_v9 = vld [vmem:[#allocation4 + $0x38] sm:$0xff] }
0x29d6   : > { %3105 = vmatmul.mubr.msk.f32.gmra.mrb[30].mxu0 %vm562_vm10, %v2417_v9 }
0x2aa9   : > { %v3106_v63 = vpop.f32.mrb[30].mxu0 }
0x2aaa   : > { %v2555_v10 = vadd.f32 %v3106_v63, %v3856_v60  ;;  %v2549_v11 = vpop.f32.mrb[31].mxu0 }
0x2aab   : > { %v2550_v13 = vadd.f32 %v3856_v60, %v2549_v11 }
0x2aac   : > { %v2755_v14 = vmul.f32 -1.442695, %v2555_v10 }
0x2aad   : > { %v2754_v62 = vmul.f32 -1.442695, %v2550_v13 }
0x2aae   : > { %3397 = vpow2.f32 %v2755_v14 }
0x2aaf   : > { %3399 = vpow2.f32 %v2754_v62 }
0x2ab8   : > { %v3398_v16 = vpop.eup %3397 }
0x2ab9   : > { %v3400_v17 = vpop.eup %3399  ;;  %v2589_v19 = vadd.f32 1.0, %v3398_v16 }
0x2aba   : > { %v2588_v37 = vadd.f32 1.0, %v3400_v17 }
0x2abb   : > { %3401 = vrcp.f32 %v2589_v19 }
0x2abc   : > { %3403 = vrcp.f32 %v2588_v37 }
0x2ac5   : > { %v3402_v22 = vpop.eup %3401 }
0x2ac6   : > { %v3404_v23 = vpop.eup %3403  ;;  %2613 = vst [vmem:[%s3487_s18 + $0x38] sm:$0xff] %v3402_v22 }
0x2ac7   : > { %2612 = vst [vmem:[%s3487_s18 + $0x30] sm:$0xff] %v3404_v23 }
0x2ac8 PF: > { %s19_s30 = sadd.s32 1, %s3411_s30  }
0x2ac9   : > { %p16_p5 = scmp.ge.s32.totalorder %s19_s30, 4  }
0x2acb   :  { %18 = sbr.rel (!%p16_p5) target bundleno = 1 (0x1), region = 106 }

</bundles_post_ra>
